<compile_context>
chip_gen: v6e
topology: v6e:2x2x1
jax: 0.10.0
libtpu: 0.0.40
codegen_flags: <defaults>
</compile_context>

<pallas_src>
import jax
import jax.numpy as jnp
from jax.experimental import pallas as pl
from jax.experimental.pallas import tpu as pltpu


def sae_forward_kernel(x_ref, we_ref, be_ref, wd_ref, bd_ref, xhat_ref, f_ref):
    """One grid step at (batch tile i, hidden tile j).

    x_ref   : [tm, D]  bf16   (dataset-norm scale already folded into we_ref)
    we_ref  : [D, th]  bf16   (scale * W_enc^T tile)
    be_ref  : [1, th]  f32
    wd_ref  : [th, D]  bf16   (W_dec^T tile)
    bd_ref  : [1, D]   f32
    xhat_ref: [tm, D]  f32    output, resident over j -> used as the accumulator
    f_ref   : [tm, th] f32/bf16
    """
    j = pl.program_id(1)

    @pl.when(j == 0)
    def _():
        xhat_ref[...] = jnp.zeros_like(xhat_ref)

    # encoder: bf16 matmul on the MXU, f32 accumulate; bias + ReLU in f32 (VPU)
    pre = jnp.dot(x_ref[...], we_ref[...], preferred_element_type=jnp.float32)
    f = jnp.maximum(pre + be_ref[...], 0.0)                       # [tm, th] f32

    # decoder partial product, accumulated straight into the resident output tile
    xhat_ref[...] += jnp.dot(f.astype(jnp.bfloat16), wd_ref[...],
                             preferred_element_type=jnp.float32)  # [tm, D]

    f_ref[...] = f.astype(f_ref.dtype)

    @pl.when(j == pl.num_programs(1) - 1)
    def _():
        xhat_ref[...] += bd_ref[...]          # add decoder bias once, at the end


def _pick_tile(dim, target, quantum):
    """Largest t <= target with dim % t == 0 and t a multiple of `quantum`
    (falls back to the full extent, which BlockSpec always accepts)."""
    t = min(target, dim)
    t = max((t // quantum) * quantum, quantum)
    while t > quantum and dim % t != 0:
        t -= quantum
    if t <= 0 or dim % t != 0:
        t = dim
    return t


def _dataset_scale(x_bf16, d):
    """preprocess_dataset scaling factor, computed from the bf16 copy of x that
    the kernel consumes (single narrow read of x)."""
    xf = x_bf16.astype(jnp.float32)
    mean_norm = jnp.mean(jnp.sqrt(jnp.sum(xf * xf, axis=-1)))
    return jnp.sqrt(jnp.float32(d)) / jnp.maximum(mean_norm, jnp.float32(1e-12))


def sae_forward(x, w_enc_t, b_enc, w_dec_t, b_dec, *, tm=512, th=512,
                f_dtype=jnp.float32, vmem_limit_bytes=48 * 1024 * 1024):
    """x: [B, D]; w_enc_t: [D, H]; b_enc: [H]; w_dec_t: [H, D]; b_dec: [D].

    Returns (x_hat [B, D] f32, f [B, H] f_dtype), matching
    SparseAutoencoder.forward (x is preprocess_dataset-scaled first).
    """
    B, D = x.shape
    H = w_enc_t.shape[1]

    # --- tile selection: lane-dense tiles; keep >= 2 batch tiles so the
    # "parallel" batch axis can be split across TensorCores (v7x). ---
    tm = _pick_tile(B, tm, 8)
    if B // tm < 2 and tm % 2 == 0 and (tm // 2) >= 8 and B % (tm // 2) == 0:
        tm //= 2
    th = _pick_tile(H, th, 128)
    grid = (B // tm, H // th)

    # --- fold the global dataset-norm scale into the encoder weights (f32
    # multiply, then bf16 cast); x travels to the kernel once, as bf16. ---
    x_bf = x.astype(jnp.bfloat16)
    scale = _dataset_scale(x_bf, D)
    w_enc_bf = (w_enc_t.astype(jnp.float32) * scale).astype(jnp.bfloat16)
    w_dec_bf = w_dec_t.astype(jnp.bfloat16)
    b_enc2 = b_enc.reshape(1, H).astype(jnp.float32)
    b_dec2 = b_dec.reshape(1, D).astype(jnp.float32)

    f_bytes = jnp.dtype(f_dtype).itemsize
    flops = 4 * B * D * H                               # encoder + decoder matmuls
    bytes_accessed = (
        B * D * 2                                       # x in (bf16, once)
        + grid[0] * (D * H * 2 + H * D * 2)             # weights re-streamed per batch tile
        + H * 4 + D * 4                                 # biases
        + B * H * f_bytes + B * D * 4)                  # f, x_hat out

    x_hat, f = pl.pallas_call(
        sae_forward_kernel,
        out_shape=(
            jax.ShapeDtypeStruct((B, D), jnp.float32),   # x_hat
            jax.ShapeDtypeStruct((B, H), f_dtype),       # f
        ),
        grid=grid,
        in_specs=[
            pl.BlockSpec((tm, D), lambda i, j: (i, 0)),   # x tile (resident over j)
            pl.BlockSpec((D, th), lambda i, j: (0, j)),   # scale * W_enc^T tile
            pl.BlockSpec((1, th), lambda i, j: (0, j)),   # b_enc tile
            pl.BlockSpec((th, D), lambda i, j: (j, 0)),   # W_dec^T tile
            pl.BlockSpec((1, D), lambda i, j: (0, 0)),    # b_dec
        ],
        out_specs=(
            pl.BlockSpec((tm, D), lambda i, j: (i, 0)),   # x_hat (accumulator over j)
            pl.BlockSpec((tm, th), lambda i, j: (i, j)),  # f
        ),
        compiler_params=pltpu.CompilerParams(
            dimension_semantics=("parallel", "arbitrary"),
            vmem_limit_bytes=vmem_limit_bytes,
        ),
        cost_estimate=pl.CostEstimate(
            flops=flops, transcendentals=0, bytes_accessed=bytes_accessed),
    )(x_bf, w_enc_bf, b_enc2, w_dec_bf, b_dec2)
    return x_hat, f


def init_sae_params(key, input_dim, hidden_dim, l2_norm):
    """Mirror SparseAutoencoder.initialize_weights deterministically."""
    # decoder.weight: [input_dim, hidden_dim]; each column rescaled to L2 == l2_norm.
    w_d = jax.random.normal(key, (input_dim, hidden_dim), dtype=jnp.float32)
    col_norm = jnp.linalg.norm(w_d, axis=0, keepdims=True)
    w_d = w_d * (l2_norm / col_norm)

    # encoder.weight = decoder.weight.T; the kernel consumes transposed weights:
    w_enc_t = w_d          # encoder.weight.T == decoder.weight -> [D, H]
    w_dec_t = w_d.T        # decoder.weight.T                   -> [H, D]
    b_enc = jnp.zeros((hidden_dim,), jnp.float32)
    b_dec = jnp.zeros((input_dim,), jnp.float32)
    return w_enc_t, b_enc, w_dec_t, b_dec


def reference_forward(x, w_enc_t, b_enc, w_dec_t, b_dec):
    """Pure-JAX reference following the kernel's exact numeric path
    (scale folded into bf16 encoder weights, bf16 matmuls, f32 accumulate)."""
    D = x.shape[-1]
    x_bf = x.astype(jnp.bfloat16)
    scale = _dataset_scale(x_bf, D)
    w_enc_bf = (w_enc_t.astype(jnp.float32) * scale).astype(jnp.bfloat16)
    pre = jnp.dot(x_bf, w_enc_bf, preferred_element_type=jnp.float32) + b_enc
    f = jnp.maximum(pre, 0.0)
    x_hat = jnp.dot(f.astype(jnp.bfloat16), w_dec_t.astype(jnp.bfloat16),
                    preferred_element_type=jnp.float32) + b_dec
    return x_hat, f


if __name__ == "__main__":
    # Small but lane-dense shapes: D, H multiples of 128; batch multiple of 8.
    B, D, H = 256, 256, 512      # batch, sae_input_dim, sae_hidden_dim
    L2_NORM = 1.0                # config.sae_l2_norm (used only at init)

    key = jax.random.PRNGKey(0)
    k_w, k_x = jax.random.split(key)
    w_enc_t, b_enc, w_dec_t, b_dec = init_sae_params(k_w, D, H, L2_NORM)
    x = jax.random.normal(k_x, (B, D), dtype=jnp.float32)

    x_hat, f = sae_forward(x, w_enc_t, b_enc, w_dec_t, b_dec)
    jax.block_until_ready((x_hat, f))

    # sanity-check against a pure-JAX reference on the same numeric path
    x_hat_ref, f_ref = reference_forward(x, w_enc_t, b_enc, w_dec_t, b_dec)
    assert jnp.allclose(f, f_ref, atol=1e-2, rtol=1e-2), "f mismatch"
    assert jnp.allclose(x_hat, x_hat_ref, atol=1e-2, rtol=1e-2), "x_hat mismatch"

    print("KERNEL_OK")
</pallas_src>

<mosaic_0001>
module attributes {stable_mosaic.version = 11 : i64} {
  func.func @sae_forward_kernel(%arg0: i32, %arg1: i32, %arg2: memref<128x256xbf16, #tpu.memory_space<vmem>>, %arg3: memref<256x512xbf16, #tpu.memory_space<vmem>>, %arg4: memref<1x512xf32, #tpu.memory_space<vmem>>, %arg5: memref<512x256xbf16, #tpu.memory_space<vmem>>, %arg6: memref<1x256xf32, #tpu.memory_space<vmem>>, %arg7: memref<128x256xf32, #tpu.memory_space<vmem>>, %arg8: memref<128x512xf32, #tpu.memory_space<vmem>>) attributes {dimension_semantics = [#tpu.dimension_semantics<parallel>, #tpu.dimension_semantics<arbitrary>], iteration_bounds = array<i64: 2, 1>, scalar_prefetch = 0 : i64, scratch_operands = 0 : i64, tpu.core_type = #tpu.core_type<tc>, window_params = [{transform_indices = @transform_0, window_bounds = array<i64: 128, 256>}, {transform_indices = @transform_1, window_bounds = array<i64: 256, 512>}, {transform_indices = @transform_2, window_bounds = array<i64: 1, 512>}, {transform_indices = @transform_3, window_bounds = array<i64: 512, 256>}, {pipeline_mode = #tpu.pipeline_mode<synchronous>, transform_indices = @transform_4, window_bounds = array<i64: 1, 256>}, {transform_indices = @transform_5, window_bounds = array<i64: 128, 256>}, {transform_indices = @transform_6, window_bounds = array<i64: 128, 512>}]} {
    %c0_i32 = arith.constant 0 : i32
    %0 = arith.cmpi eq, %arg1, %c0_i32 : i32
    %1 = arith.extui %0 : i1 to i32
    %c0_i32_0 = arith.constant 0 : i32
    %2 = arith.cmpi ne, %1, %c0_i32_0 : i32
    scf.if %2 {
      %cst_18 = arith.constant 0.000000e+00 : f32
      %21 = vector.broadcast %cst_18 : f32 to vector<128x256xf32>
      %c0_19 = arith.constant 0 : index
      %c0_20 = arith.constant 0 : index
      %22 = vector.load %arg7[%c0_19, %c0_20] : memref<128x256xf32, #tpu.memory_space<vmem>>, vector<128x256xf32>
      tpu.vector_store %arg7[%c0_19, %c0_20], %21 {strides = array<i32>} : memref<128x256xf32, #tpu.memory_space<vmem>>, vector<128x256xf32>,
    } else {
    }
    %c0 = arith.constant 0 : index
    %c0_1 = arith.constant 0 : index
    %3 = vector.load %arg2[%c0, %c0_1] : memref<128x256xbf16, #tpu.memory_space<vmem>>, vector<128x256xbf16>
    %c0_2 = arith.constant 0 : index
    %c0_3 = arith.constant 0 : index
    %4 = vector.load %arg3[%c0_2, %c0_3] : memref<256x512xbf16, #tpu.memory_space<vmem>>, vector<256x512xbf16>
    %cst = arith.constant dense<0.000000e+00> : vector<128x512xf32>
    %5 = tpu.matmul %3, %4, %cst {dimension_numbers = #tpu.dot_dimension_numbers<[1], [0], [0], [1], [0, 0, 1, 1], [], []>} : vector<128x256xbf16>, vector<256x512xbf16>, vector<128x512xf32> -> vector<128x512xf32>
    %c0_4 = arith.constant 0 : index
    %c0_5 = arith.constant 0 : index
    %6 = vector.load %arg4[%c0_4, %c0_5] : memref<1x512xf32, #tpu.memory_space<vmem>>, vector<1x512xf32>
    %7 = vector.broadcast %6 : vector<1x512xf32> to vector<128x512xf32>
    %8 = arith.addf %5, %7 : vector<128x512xf32>
    %cst_6 = arith.constant 0.000000e+00 : f32
    %9 = vector.broadcast %cst_6 : f32 to vector<128x512xf32>
    %10 = arith.maximumf %8, %9 : vector<128x512xf32>
    %c0_7 = arith.constant 0 : index
    %c0_8 = arith.constant 0 : index
    %11 = vector.load %arg7[%c0_7, %c0_8] : memref<128x256xf32, #tpu.memory_space<vmem>>, vector<128x256xf32>
    %12 = arith.truncf %10 : vector<128x512xf32> to vector<128x512xbf16>
    %c0_9 = arith.constant 0 : index
    %c0_10 = arith.constant 0 : index
    %13 = vector.load %arg5[%c0_9, %c0_10] : memref<512x256xbf16, #tpu.memory_space<vmem>>, vector<512x256xbf16>
    %cst_11 = arith.constant dense<0.000000e+00> : vector<128x256xf32>
    %14 = tpu.matmul %12, %13, %cst_11 {dimension_numbers = #tpu.dot_dimension_numbers<[1], [0], [0], [1], [0, 0, 1, 1], [], []>} : vector<128x512xbf16>, vector<512x256xbf16>, vector<128x256xf32> -> vector<128x256xf32>
    %15 = arith.addf %11, %14 : vector<128x256xf32>
    %c0_12 = arith.constant 0 : index
    %c0_13 = arith.constant 0 : index
    %16 = vector.load %arg7[%c0_12, %c0_13] : memref<128x256xf32, #tpu.memory_space<vmem>>, vector<128x256xf32>
    tpu.vector_store %arg7[%c0_12, %c0_13], %15 {strides = array<i32>} : memref<128x256xf32, #tpu.memory_space<vmem>>, vector<128x256xf32>,
    %c0_14 = arith.constant 0 : index
    %c0_15 = arith.constant 0 : index
    %17 = vector.load %arg8[%c0_14, %c0_15] : memref<128x512xf32, #tpu.memory_space<vmem>>, vector<128x512xf32>
    tpu.vector_store %arg8[%c0_14, %c0_15], %10 {strides = array<i32>} : memref<128x512xf32, #tpu.memory_space<vmem>>, vector<128x512xf32>,
    %c0_i32_16 = arith.constant 0 : i32
    %18 = arith.cmpi eq, %arg1, %c0_i32_16 : i32
    %19 = arith.extui %18 : i1 to i32
    %c0_i32_17 = arith.constant 0 : i32
    %20 = arith.cmpi ne, %19, %c0_i32_17 : i32
    scf.if %20 {
      %c0_18 = arith.constant 0 : index
      %c0_19 = arith.constant 0 : index
      %21 = vector.load %arg7[%c0_18, %c0_19] : memref<128x256xf32, #tpu.memory_space<vmem>>, vector<128x256xf32>
      %c0_20 = arith.constant 0 : index
      %c0_21 = arith.constant 0 : index
      %22 = vector.load %arg6[%c0_20, %c0_21] : memref<1x256xf32, #tpu.memory_space<vmem>>, vector<1x256xf32>
      %23 = vector.broadcast %22 : vector<1x256xf32> to vector<128x256xf32>
      %24 = arith.addf %21, %23 : vector<128x256xf32>
      %c0_22 = arith.constant 0 : index
      %c0_23 = arith.constant 0 : index
      %25 = vector.load %arg7[%c0_22, %c0_23] : memref<128x256xf32, #tpu.memory_space<vmem>>, vector<128x256xf32>
      tpu.vector_store %arg7[%c0_22, %c0_23], %24 {strides = array<i32>} : memref<128x256xf32, #tpu.memory_space<vmem>>, vector<128x256xf32>,
    } else {
    }
    return
  }
  func.func @transform_0(%arg0: i32, %arg1: i32) -> (i32, i32) {
    %c0_i32 = arith.constant 0 : i32
    %c0_i32_0 = arith.constant 0 : i32
    return %arg0, %c0_i32 : i32, i32
  }
  func.func @transform_1(%arg0: i32, %arg1: i32) -> (i32, i32) {
    %c0_i32 = arith.constant 0 : i32
    %c0_i32_0 = arith.constant 0 : i32
    return %c0_i32, %arg1 : i32, i32
  }
  func.func @transform_2(%arg0: i32, %arg1: i32) -> (i32, i32) {
    %c0_i32 = arith.constant 0 : i32
    %c0_i32_0 = arith.constant 0 : i32
    return %c0_i32, %arg1 : i32, i32
  }
  func.func @transform_3(%arg0: i32, %arg1: i32) -> (i32, i32) {
    %c0_i32 = arith.constant 0 : i32
    %c0_i32_0 = arith.constant 0 : i32
    return %arg1, %c0_i32 : i32, i32
  }
  func.func @transform_4(%arg0: i32, %arg1: i32) -> (i32, i32) {
    %c0_i32 = arith.constant 0 : i32
    %c0_i32_0 = arith.constant 0 : i32
    %c0_i32_1 = arith.constant 0 : i32
    return %c0_i32, %c0_i32_0 : i32, i32
  }
  func.func @transform_5(%arg0: i32, %arg1: i32) -> (i32, i32) {
    %c0_i32 = arith.constant 0 : i32
    %c0_i32_0 = arith.constant 0 : i32
    return %arg0, %c0_i32 : i32, i32
  }
  func.func @transform_6(%arg0: i32, %arg1: i32) -> (i32, i32) {
    %c0_i32 = arith.constant 0 : i32
    return %arg0, %arg1 : i32, i32
  }
}

</mosaic_0001>

<bundles_post_ra>
// kernel: tpu_custom_call.1
= control target key start
LH: loop header
LB: loop body
LE: loop exit
PB: predicated region body
PF: predicated region fallthrough
CT: control target
= control target key end

     0   :  { %s3561_s0 = inlined_call_operand.hbm [shape: bf16[256,256], index: 0, kind: input, shape index: {}]   ;;  %s3562_s1 = inlined_call_operand.hbm [shape: bf16[256,512], index: 1, kind: input, shape index: {}]   ;;  %s3563_s2 = inlined_call_operand.hbm [shape: f32[1,512], index: 2, kind: input, shape index: {}]   ;;  %s3564_s3 = inlined_call_operand.hbm [shape: bf16[512,256], index: 3, kind: input, shape index: {}]   ;;  %s3565_s4 = inlined_call_operand.vmem [shape: f32[1,256], index: 4, kind: input, shape index: {}]   ;;  %s3566_s5 = inlined_call_operand.hbm [shape: f32[256,256], index: 5, kind: output, shape index: {0}]   ;;  %s3567_s6 = inlined_call_operand.hbm [shape: f32[256,512], index: 6, kind: output, shape index: {1}]  }
   0x1   :  { %3574 = sst [smem:[#allocation18_spill]] %s3562_s1 }
   0x2   :  { %3575 = sst [smem:[#allocation19_spill]] %s3563_s2 }
   0x3   :  { %12 = vsyncpa [#allocation3], 0 }
   0x4   :  { %14 = vsyncpa [#allocation3 + $0x1], 0 }
   0x5   :  { %15 = vsyncpa [#allocation6], 0 }
   0x6   :  { %16 = vsyncpa [#allocation9], 0 }
   0x7   :  { %17 = vsyncpa [#allocation4], 0 }
   0x8   :  { %19 = vsyncpa [#allocation4 + $0x1], 0 }
   0x9   :  { %20 = vsyncpa [#allocation12], 0 }
   0xa   :  { %22 = vsyncpa [#allocation12 + $0x1], 0  ;;  %s3077_s21 = smov 0   ;;  %s3079_s22 = smov 0  }
   0xb   :  { %s3081_s23 = smov 0   ;;  %s3083_s24 = smov 0  }
   0xc   :  { %s3085_s25 = smov 0   ;;  %s3087_s26 = smov 0  }
   0xd LB: > { %s2301_s27 = sadd.s32 4294967295, %s3026_s26   ;;  %s2302_s28 = sadd.s32 4294967294, %s3026_s26   ;;  %s3026_s26 = sphi %s3087_s26, %s28_s26   ;;  %s3022_s25 = sphi %s3085_s25, %s3597_s25   ;;  %s3018_s24 = sphi %s3083_s24, %s3596_s24   ;;  %s3014_s23 = sphi %s3081_s23, %s3595_s23   ;;  %s3010_s22 = sphi %s3079_s22, %s3594_s22   ;;  %s3006_s21 = sphi %s3077_s21, %s3593_s21  }
   0xe   : > { %p60_p0 = scmp.ne.s32.totalorder %s3010_s22, %s3006_s21  ;;  %p3111_p1 = scmp.eq.s32.totalorder %s2301_s27, 0 }
   0xf   : > { %p3115_p2 = scmp.eq.s32.totalorder %s2301_s27, 1  ;;  %p189_p3 = scmp.eq.s32.totalorder %s2302_s28, 1 }
  0x10   : > { %s3576_s29 = scalar_select %p3111_p1, 1, 0 }
  0x11   : > { %p3121_p4 = por %p3111_p1, %p60_p0  ;;  %p2303_p5 = scmp.ge.s32.totalorder %s3026_s26, 1 }
  0x12   : > { %p3126_p6 = por %p189_p3, %p60_p0  ;;  %p224_p7 = scmp.lt.s32.totalorder %s3026_s26, 3 }
  0x13   : > { %s3578_s7 = scalar_select %p3121_p4, 1, 0 }
  0x14   : > { %s3579_s8 = scalar_select %p3126_p6, 1, 0 }
  0x15   : > { %p3131_p8 = pnand %p2303_p5, %p224_p7  ;;  %s3028_s10 = smov [#allocation5]  }
  0x16   : > { %s239_s11 = sshll.u32 %s3028_s10, 4  ;;  %s3029_s13 = smov [#allocation7]   ;;  %s240_s11 = int_to_ptr.vmem [resolvable:$true] %s239_s11 }
  0x17   : > { %s3580_s9 = scalar_select %p3131_p8, 1, 0 }
  0x18   : > { %p2497_p9 = pneg %p3131_p8  ;;  %s256_s14 = sshll.u32 %s3029_s13, 4  ;;  %s257_s14 = int_to_ptr.vmem [resolvable:$true] %s256_s14 }
  0x19   : > { %s3030_s15 = smov [#allocation8]   ;;  %s2813_s17 = scalar_lea.vmem %s240_s11, 8192 }
  0x1a   : > { %p3140_p11 = pnand %p2497_p9, %p3111_p1  ;;  %s270_s16 = sshll.u32 %s3030_s15, 4  ;;  %s271_s16 = int_to_ptr.vmem [resolvable:$true] %s270_s16 }
  0x1b   : > { %p2814_p13 = scmp.ne.s32.totalorder %s240_s11, %s2813_s17  ;;  %p2821_p5 = scmp.lt.s32.totalorder %s240_s11, %s240_s11 }
  0x1c   : > { %p2804_p12 = pneg %p3140_p11  ;;  %p2822_p7 = scmp.lt.s32.totalorder %s2813_s17, %s2813_s17 }
  0x1e   : > { %p2816_p0 = pnand %p2814_p13, %p2804_p12  ;;  %p2823_p9 = por %p2822_p7, %p2821_p5 }
  0x20   : > { %p2817_p3 = pneg %p2816_p0 }
  0x22   : > { %p2824_p10 = pnand %p2823_p9, %p2817_p3 }
  0x24   : > { %2827 = shalt.err (!%p2824_p10)
}
  0x25   : > { %s3031_s18 = smov 256   ;;  %s3032_s19 = smov 16  }
  0x26   : > { %s3582_s1 = sld [smem:[#allocation18_spill]]  ;;  %s2839_s28 = scalar_lea.vmem %s257_s14, 64 }
  0x27   : > { %p2840_p6 = scmp.ne.s32.totalorder %s257_s14, %s2839_s28  ;;  %p2847_p1 = scmp.lt.s32.totalorder %s257_s14, %s257_s14 }
  0x28   : > { %p2848_p4 = scmp.lt.s32.totalorder %s2839_s28, %s2839_s28 }
  0x29   : > { %p2842_p13 = pnand %p2840_p6, %p2804_p12 }
  0x2a   : > { %p2849_p5 = por %p2848_p4, %p2847_p1 }
  0x2b   : > { %p2843_p0 = pneg %p2842_p13 }
  0x2c   : > { %2500 = dma.hbm_to_vmem [thread:$0]  (!%p3140_p11), %s3582_s1, 8192, %s240_s11, [#allocation6], %s3031_s18, %s3031_s18, %s3032_s19  }
  0x2d   : > { %p2850_p3 = pnand %p2849_p5, %p2843_p0 }
  0x2f   : > { %2853 = shalt.err (!%p2850_p3)
}
  0x30   : > { %s3583_s2 = sld [smem:[#allocation19_spill]]  ;;  %s2865_s11 = scalar_lea.vmem %s271_s16, 8192 }
  0x31   : > { %p2866_p10 = scmp.ne.s32.totalorder %s271_s16, %s2865_s11  ;;  %p2873_p9 = scmp.lt.s32.totalorder %s271_s16, %s271_s16 }
  0x32   : > { %p2874_p13 = scmp.lt.s32.totalorder %s2865_s11, %s2865_s11 }
  0x33   : > { %p2868_p7 = pnand %p2866_p10, %p2804_p12 }
  0x34   : > { %p2875_p8 = por %p2874_p13, %p2873_p9 }
  0x35   : > { %p2869_p6 = pneg %p2868_p7 }
  0x36   : > { %2503 = dma.hbm_to_vmem [thread:$0]  (!%p3140_p11), %s3583_s2, 64, %s257_s14, [#allocation6]  }
  0x37   : > { %p2876_p1 = pnand %p2875_p8, %p2869_p6 }
  0x39   : > { %2879 = shalt.err (!%p2876_p1)
}
  0x3a   : > { %s3572_s15 = smov 128   ;;  %s3573_s14 = smov 8  }
  0x3b   : > { %2506 = dma.hbm_to_vmem [thread:$0]  (!%p3140_p11), %s3564_s3, 8192, %s271_s16, [#allocation9], %s3572_s15, %s3572_s15, %s3573_s14  }
  0x3c   : > { %s47_s19 = sadd.s32 1, %s3014_s23  ;;  %s40_s20 = sadd.s32 1, %s3022_s25 }
  0x3d   : > { %p54_p4 = scmp.ne.s32.totalorder %s3014_s23, %s3010_s22  ;;  %p42_p8 = scmp.ge.s32.totalorder %s40_s20, 2 }
  0x3e   : > { %p55_p12 = scmp.eq.s32.totalorder %s3026_s26, 0  ;;  %p2521_p5 = scmp.lt.s32.totalorder %s3026_s26, 2 }
  0x3f   : > { %p3180_p0 = por %p3115_p2, %p54_p4  ;;  %s3599_s20 = smov (%p42_p8, %s40_s20), 0 }
  0x40   : > { %p56_p3 = por %p55_p12, %p54_p4  ;;  %s287_s12 = sand.u32 1, %s3014_s23  }
  0x41   : > { %s44_s28 = ssub.s32 %s3022_s25, %s3599_s20  ;;  %s2308_s16 = sshll.u32 %s287_s12, 7 }
  0x42   : > { %p45_p10 = scmp.eq.s32.totalorder %s44_s28, 0  ;;  %s2474_s10 = sshll.u32 %s3022_s25, 11 }
  0x43   : > { %s298_s30 = scalar_lea.hbm %s3561_s0, %s2474_s10  ;;  %s291_s18 = scalar_lea.vmem [#allocation2], %s2308_s16 }
  0x44   : > { %s3192_s13 = scalar_select %p45_p10, %s3014_s23, %s47_s19  }
  0x45   : > { %s299_s15 = sshll.u32 %s291_s18, 4  ;;  %p3199_p2 = pnand %p2521_p5, %p56_p3  ;;  %s300_s15 = int_to_ptr.vmem [resolvable:$true] %s299_s15 }
  0x46   : > { %s288_s1 = scalar_lea.sflag [#allocation3], %s287_s12  ;;  %s2893_s28 = scalar_lea.vmem %s300_s15, 2048 }
  0x47   : > { %p2882_p11 = pneg %p3199_p2  ;;  %p2894_p7 = scmp.ne.s32.totalorder %s300_s15, %s2893_s28 }
  0x48   : > { %s3035_s19 = smov [#allocation2]  }
  0x49   : > { %p2896_p6 = pnand %p2894_p7, %p2882_p11  ;;  %s2898_s2 = sshll.u32 %s3035_s19, 4  ;;  %s2899_s2 = int_to_ptr.vmem [resolvable:$false] %s2898_s2 }
  0x4a   : > { %s2900_s10 = scalar_lea.vmem %s2899_s2, 4096  ;;  %p2901_p13 = scmp.lt.s32.totalorder %s300_s15, %s2899_s2 }
  0x4b   : > { %p2897_p9 = pneg %p2896_p6  ;;  %p2902_p1 = scmp.lt.s32.totalorder %s2900_s10, %s2893_s28 }
  0x4d   : > { %p2903_p4 = por %p2902_p1, %p2901_p13 }
  0x4f   : > { %p2904_p8 = pnand %p2903_p4, %p2897_p9 }
  0x51   : > { %2907 = shalt.err (!%p2904_p8)
}
  0x52   : > { %s3586_s16 = smov 8   ;;  %s3587_s11 = smov 128  }
  0x53   : > { %2510 = dma.hbm_to_vmem [thread:$0]  (!%p3199_p2), %s298_s30, 2048, %s300_s15, %s288_s1, %s3587_s11, %s3587_s11, %s3586_s16  }
  0x54   : > { %p3588_p12 = scmp.ne.s32.totalorder %s3580_s9, 0 }
  0x55   : > { %s3213_s12 = sand.u32 (!%p3588_p12), 1, %s3010_s22   ;;  %p3589_p5 = scmp.ne.s32.totalorder (!%p3588_p12), %s3578_s7, 0 }
  0x56   : > { %311 = sbr.rel (%p3588_p12) target bundleno = 641 (0x281), region = 40  ;;  %s2313_s2 = sshll.u32 (!%p3588_p12), %s3213_s12, 7 }
  0x57   : > { %s314_s17 = scalar_lea.sflag (!%p3588_p12), [#allocation3], %s3213_s12  ;;  %s3217_s18 = scalar_lea.vmem (!%p3588_p12), [#allocation2], %s2313_s2 }
  0x5b   : > { %2985 = dma.done.wait (%p3589_p5), %s314_s17, 2048  }
  0x5c   : > { %2987 = vsyncadd (%p3589_p5), %s314_s17, 4294965248  ;;  %p3590_p3 = scmp.ne.s32.totalorder %s3576_s29, 0 }
  0x5e   : > { %2989 = dma.done.wait (%p3590_p3), [#allocation6], 8256  }
  0x5f   : > { %2991 = vsyncadd (%p3590_p3), [#allocation6], 4294959040 }
  0x60   : > { %2993 = dma.done.wait (%p3590_p3), [#allocation9], 8192  }
  0x61   : > { %2995 = vsyncadd (%p3590_p3), [#allocation9], 4294959104  ;;  %v2586_v0 = vld [vmem:[#allocation5 + $0xe4] ss:$16 sps:$4 sm:$0xff]   ;;  %v2588_v1 = vld [vmem:[#allocation5 + $0xec] ss:$16 sps:$4 sm:$0xff]  }
  0x62   : > { %908 = vmatprep.subr.bf16.mxu0 %v2586_v0  ;;  %v2590_v2 = vld [vmem:[#allocation5 + $0xe0] ss:$16 sps:$4 sm:$0xff]   ;;  %v2591_v3 = vld [vmem:[#allocation5 + $0xe8] ss:$16 sps:$4 sm:$0xff]   ;;  %1021 = vmatprep.subr.bf16.mxu1 %v2588_v1  ;;  %v2592_v4 = vld [vmem:[#allocation5 + $0xc4] ss:$16 sps:$4 sm:$0xff]  }
  0x63   : > { %909 = vmatpush1.bf16.msra.mxu0 %v2590_v2  ;;  %1022 = vmatpush1.bf16.msra.mxu1 %v2591_v3  ;;  %v2594_v5 = vld [vmem:[#allocation5 + $0xcc] ss:$16 sps:$4 sm:$0xff]   ;;  %v2596_v6 = vld [vmem:[#allocation5 + $0xc0] ss:$16 sps:$4 sm:$0xff]   ;;  %v2597_v7 = vld [vmem:[#allocation5 + $0xc8] ss:$16 sps:$4 sm:$0xff]  }
  0x64   : > { %910 = vmatprep.subr.bf16.mxu0 %v2592_v4  ;;  %1023 = vmatprep.subr.bf16.mxu1 %v2594_v5  ;;  %v2598_v8 = vld [vmem:[#allocation5 + $0xa4] ss:$16 sps:$4 sm:$0xff]   ;;  %v2600_v9 = vld [vmem:[#allocation5 + $0xac] ss:$16 sps:$4 sm:$0xff]   ;;  %v2602_v10 = vld [vmem:[#allocation5 + $0xa0] ss:$16 sps:$4 sm:$0xff]  }
  0x65   : > { %v2603_v11 = vld [vmem:[#allocation5 + $0xa8] ss:$16 sps:$4 sm:$0xff]   ;;  %v2604_v12 = vld [vmem:[#allocation5 + $0x84] ss:$16 sps:$4 sm:$0xff]   ;;  %v2606_v13 = vld [vmem:[#allocation5 + $0x8c] ss:$16 sps:$4 sm:$0xff]  }
  0x66   : > { %v2608_v14 = vld [vmem:[#allocation5 + $0x80] ss:$16 sps:$4 sm:$0xff]   ;;  %v2609_v15 = vld [vmem:[#allocation5 + $0x88] ss:$16 sps:$4 sm:$0xff]   ;;  %v2610_v16 = vld [vmem:[#allocation5 + $0x64] ss:$16 sps:$4 sm:$0xff]  }
  0x67   : > { %911 = vmatpush1.bf16.msra.mxu0 %v2596_v6  ;;  %1024 = vmatpush1.bf16.msra.mxu1 %v2597_v7  ;;  %v2612_v17 = vld [vmem:[#allocation5 + $0x6c] ss:$16 sps:$4 sm:$0xff]   ;;  %v2614_v18 = vld [vmem:[#allocation5 + $0x60] ss:$16 sps:$4 sm:$0xff]   ;;  %v2615_v19 = vld [vmem:[#allocation5 + $0x68] ss:$16 sps:$4 sm:$0xff]  }
  0x68   : > { %912 = vmatprep.subr.bf16.mxu0 %v2598_v8  ;;  %1025 = vmatprep.subr.bf16.mxu1 %v2600_v9  ;;  %v2616_v20 = vld [vmem:[#allocation5 + $0x44] ss:$16 sps:$4 sm:$0xff]   ;;  %v2618_v21 = vld [vmem:[#allocation5 + $0x4c] ss:$16 sps:$4 sm:$0xff]   ;;  %v2620_v22 = vld [vmem:[#allocation5 + $0x40] ss:$16 sps:$4 sm:$0xff]  }
  0x69   : > { %v2621_v23 = vld [vmem:[#allocation5 + $0x48] ss:$16 sps:$4 sm:$0xff]   ;;  %v2622_v24 = vld [vmem:[#allocation5 + $0x24] ss:$16 sps:$4 sm:$0xff]   ;;  %v2624_v25 = vld [vmem:[#allocation5 + $0x2c] ss:$16 sps:$4 sm:$0xff]  }
  0x6a   : > { %v2626_v26 = vld [vmem:[#allocation5 + $0x20] ss:$16 sps:$4 sm:$0xff]   ;;  %v2627_v27 = vld [vmem:[#allocation5 + $0x28] ss:$16 sps:$4 sm:$0xff]   ;;  %v2628_v28 = vld [vmem:[#allocation5 + $0x4] ss:$16 sps:$4 sm:$0xff]  }
  0x6b   : > { %913 = vmatpush1.bf16.msra.mxu0 %v2602_v10  ;;  %1026 = vmatpush1.bf16.msra.mxu1 %v2603_v11  ;;  %v2630_v29 = vld [vmem:[#allocation5 + $0xc] ss:$16 sps:$4 sm:$0xff]   ;;  %v2632_v30 = vld [vmem:[#allocation5] ss:$16 sps:$4 sm:$0xff]   ;;  %v2633_v31 = vld [vmem:[#allocation5 + $0x8] ss:$16 sps:$4 sm:$0xff]  }
  0x6c   : > { %914 = vmatprep.subr.bf16.mxu0 %v2604_v12  ;;  %1027 = vmatprep.subr.bf16.mxu1 %v2606_v13  ;;  %v2634_v32 = vld [vmem:[#allocation5 + $0x1e4] ss:$16 sps:$4 sm:$0xff]   ;;  %v2636_v33 = vld [vmem:[#allocation5 + $0x1ec] ss:$16 sps:$4 sm:$0xff]   ;;  %v2638_v34 = vld [vmem:[#allocation5 + $0x1e0] ss:$16 sps:$4 sm:$0xff]  }
  0x6d   : > { %v2639_v35 = vld [vmem:[#allocation5 + $0x1e8] ss:$16 sps:$4 sm:$0xff]   ;;  %v2640_v36 = vld [vmem:[#allocation5 + $0x1c4] ss:$16 sps:$4 sm:$0xff]   ;;  %v2642_v37 = vld [vmem:[#allocation5 + $0x1cc] ss:$16 sps:$4 sm:$0xff]  }
  0x6e   : > { %v2644_v38 = vld [vmem:[#allocation5 + $0x1c0] ss:$16 sps:$4 sm:$0xff]   ;;  %v2645_v39 = vld [vmem:[#allocation5 + $0x1c8] ss:$16 sps:$4 sm:$0xff]   ;;  %v2646_v40 = vld [vmem:[#allocation5 + $0x1a4] ss:$16 sps:$4 sm:$0xff]  }
  0x6f   : > { %915 = vmatpush1.bf16.msra.mxu0 %v2608_v14  ;;  %1028 = vmatpush1.bf16.msra.mxu1 %v2609_v15  ;;  %v2648_v41 = vld [vmem:[#allocation5 + $0x1ac] ss:$16 sps:$4 sm:$0xff]   ;;  %v2650_v42 = vld [vmem:[#allocation5 + $0x1a0] ss:$16 sps:$4 sm:$0xff]   ;;  %v2651_v43 = vld [vmem:[#allocation5 + $0x1a8] ss:$16 sps:$4 sm:$0xff]  }
  0x70   : > { %916 = vmatprep.subr.bf16.mxu0 %v2610_v16  ;;  %1029 = vmatprep.subr.bf16.mxu1 %v2612_v17  ;;  %v2652_v44 = vld [vmem:[#allocation5 + $0x184] ss:$16 sps:$4 sm:$0xff]   ;;  %v2654_v45 = vld [vmem:[#allocation5 + $0x18c] ss:$16 sps:$4 sm:$0xff]   ;;  %v2656_v46 = vld [vmem:[#allocation5 + $0x180] ss:$16 sps:$4 sm:$0xff]  }
  0x71   : > { %v2657_v47 = vld [vmem:[#allocation5 + $0x188] ss:$16 sps:$4 sm:$0xff]   ;;  %v2684_v48 = vld [vmem:[%s3217_s18 + $0x4] ss:$8 sps:$4 sm:$0xff]   ;;  %v2662_v51 = vld [vmem:[#allocation5 + $0x160] ss:$16 sps:$4 sm:$0xff]  }
  0x72   : > { %v2658_v49 = vld [vmem:[#allocation5 + $0x164] ss:$16 sps:$4 sm:$0xff]   ;;  %v2660_v50 = vld [vmem:[#allocation5 + $0x16c] ss:$16 sps:$4 sm:$0xff]   ;;  %940 = vmatprep.mubr.bf16.mxu0 %v2684_v48  ;;  %1053 = vmatprep.mubr.bf16.mxu1 %v2684_v48  ;;  %v2663_v52 = vld [vmem:[#allocation5 + $0x168] ss:$16 sps:$4 sm:$0xff]  }
  0x73   : > { %917 = vmatpush1.bf16.msra.mxu0 %v2614_v18  ;;  %1030 = vmatpush1.bf16.msra.mxu1 %v2615_v19  ;;  %v2664_v53 = vld [vmem:[#allocation5 + $0x144] ss:$16 sps:$4 sm:$0xff]   ;;  %v2666_v54 = vld [vmem:[#allocation5 + $0x14c] ss:$16 sps:$4 sm:$0xff]   ;;  %v2668_v55 = vld [vmem:[#allocation5 + $0x140] ss:$16 sps:$4 sm:$0xff]  }
  0x74   : > { %918 = vmatprep.subr.bf16.mxu0 %v2616_v20  ;;  %1031 = vmatprep.subr.bf16.mxu1 %v2618_v21  ;;  %v2669_v56 = vld [vmem:[#allocation5 + $0x148] ss:$16 sps:$4 sm:$0xff]   ;;  %v2670_v57 = vld [vmem:[#allocation5 + $0x124] ss:$16 sps:$4 sm:$0xff]   ;;  %v2672_v58 = vld [vmem:[#allocation5 + $0x12c] ss:$16 sps:$4 sm:$0xff]  }
  0x75   : > { %v2674_v59 = vld [vmem:[#allocation5 + $0x120] ss:$16 sps:$4 sm:$0xff]   ;;  %v2675_v60 = vld [vmem:[#allocation5 + $0x128] ss:$16 sps:$4 sm:$0xff]   ;;  %v2676_v61 = vld [vmem:[#allocation5 + $0x104] ss:$16 sps:$4 sm:$0xff]  }
  0x76   : > { %v2678_v62 = vld [vmem:[#allocation5 + $0x10c] ss:$16 sps:$4 sm:$0xff]   ;;  %v2680_v63 = vld [vmem:[#allocation5 + $0x100] ss:$16 sps:$4 sm:$0xff]   ;;  %v2681_v0 = vld [vmem:[#allocation5 + $0x108] ss:$16 sps:$4 sm:$0xff]  }
  0x77   : > { %919 = vmatpush1.bf16.msra.mxu0 %v2620_v22  ;;  %1032 = vmatpush1.bf16.msra.mxu1 %v2621_v23  ;;  %v2708_v1 = vld [vmem:[#allocation8 + $0x74] ss:$8 sps:$4 sm:$0xff]   ;;  %v2685_v4 = vld [vmem:[%s3217_s18 + $0x14] ss:$8 sps:$4 sm:$0xff]   ;;  %v2714_v7 = vld [vmem:[#allocation8 + $0x64] ss:$8 sps:$4 sm:$0xff]  }
  0x78   : > { %920 = vmatprep.subr.bf16.mxu0 %v2622_v24  ;;  %1033 = vmatprep.subr.bf16.mxu1 %v2624_v25  ;;  %v2711_v2 = vld [vmem:[#allocation8 + $0x174] ss:$8 sps:$4 sm:$0xff]   ;;  %v2706_v5 = vld [vmem:[#allocation8 + $0x70] ss:$8 sps:$4 sm:$0xff]   ;;  %v2717_v8 = vld [vmem:[#allocation8 + $0x164] ss:$8 sps:$4 sm:$0xff]  }
  0x79   : > { %v2682_v3 = vld [vmem:[%s3217_s18] ss:$8 sps:$4 sm:$0xff]   ;;  %v2709_v6 = vld [vmem:[#allocation8 + $0x170] ss:$8 sps:$4 sm:$0xff]   ;;  %v2712_v9 = vld [vmem:[#allocation8 + $0x60] ss:$8 sps:$4 sm:$0xff]  }
  0x7a   : > { %v2715_v10 = vld [vmem:[#allocation8 + $0x160] ss:$8 sps:$4 sm:$0xff]   ;;  %v2720_v11 = vld [vmem:[#allocation8 + $0x54] ss:$8 sps:$4 sm:$0xff]   ;;  %v2718_v15 = vld [vmem:[#allocation8 + $0x50] ss:$8 sps:$4 sm:$0xff]  }
  0x7b   : > { %921 = vmatpush1.bf16.msra.mxu0 %v2626_v26  ;;  %1034 = vmatpush1.bf16.msra.mxu1 %v2627_v27  ;;  %v2723_v12 = vld [vmem:[#allocation8 + $0x154] ss:$8 sps:$4 sm:$0xff]   ;;  %v2688_v14 = vld [vmem:[%s3217_s18 + $0x24] ss:$8 sps:$4 sm:$0xff]   ;;  %v2721_v16 = vld [vmem:[#allocation8 + $0x150] ss:$8 sps:$4 sm:$0xff]  }
  0x7c   : > { %922 = vmatprep.subr.bf16.mxu0 %v2628_v28  ;;  %1035 = vmatprep.subr.bf16.mxu1 %v2630_v29  ;;  %v2687_v13 = vld [vmem:[%s3217_s18 + $0x10] ss:$8 sps:$4 sm:$0xff]   ;;  %v2724_v19 = vld [vmem:[#allocation8 + $0x40] ss:$8 sps:$4 sm:$0xff]   ;;  %v2690_v23 = vld [vmem:[%s3217_s18 + $0x20] ss:$8 sps:$4 sm:$0xff]  }
  0x7d   : > { %v2726_v17 = vld [vmem:[#allocation8 + $0x44] ss:$8 sps:$4 sm:$0xff]   ;;  %v2727_v20 = vld [vmem:[#allocation8 + $0x140] ss:$8 sps:$4 sm:$0xff]   ;;  %v2732_v21 = vld [vmem:[#allocation8 + $0x34] ss:$8 sps:$4 sm:$0xff]  }
  0x7e   : > { %v2729_v18 = vld [vmem:[#allocation8 + $0x144] ss:$8 sps:$4 sm:$0xff]   ;;  %v2735_v22 = vld [vmem:[#allocation8 + $0x134] ss:$8 sps:$4 sm:$0xff]   ;;  %v2691_v24 = vld [vmem:[%s3217_s18 + $0x34] ss:$8 sps:$4 sm:$0xff]  }
  0x7f   : > { %923 = vmatpush1.bf16.msra.mxu0 %v2632_v30  ;;  %1036 = vmatpush1.bf16.msra.mxu1 %v2633_v31  ;;  %v2730_v25 = vld [vmem:[#allocation8 + $0x30] ss:$8 sps:$4 sm:$0xff]   ;;  %v2738_v27 = vld [vmem:[#allocation8 + $0x24] ss:$8 sps:$4 sm:$0xff]   ;;  %v2736_v29 = vld [vmem:[#allocation8 + $0x20] ss:$8 sps:$4 sm:$0xff]  }
  0x80   : > { %924 = vmatprep.subr.bf16.mxu0 %v2634_v32  ;;  %1037 = vmatprep.subr.bf16.mxu1 %v2636_v33  ;;  %v2733_v26 = vld [vmem:[#allocation8 + $0x130] ss:$8 sps:$4 sm:$0xff]   ;;  %v2741_v28 = vld [vmem:[#allocation8 + $0x124] ss:$8 sps:$4 sm:$0xff]   ;;  %v2739_v31 = vld [vmem:[#allocation8 + $0x120] ss:$8 sps:$4 sm:$0xff]  }
  0x81   : > { %v2693_v30 = vld [vmem:[%s3217_s18 + $0x30] ss:$8 sps:$4 sm:$0xff]   ;;  %v2694_v32 = vld [vmem:[%s3217_s18 + $0x44] ss:$8 sps:$4 sm:$0xff]   ;;  %s2318_s1 = sshll.u32 %s3213_s12, 9  ;;  %s2478_s7 = sshll.u32 %s3018_s24, 13 }
  0x82   : > { %v2744_v33 = vld [vmem:[#allocation8 + $0x14] ss:$8 sps:$4 sm:$0xff]   ;;  %v2765_v48 = vld [vmem:[#allocation8 + $0x1e4] ss:$8 sps:$4 sm:$0xff]   ;;  %s3270_s29 = scalar_lea.vmem [#allocation11], %s2318_s1  ;;  %s3401_s30 = scalar_lea.hbm %s3567_s6, %s2478_s7 }
  0x83   : > { %925 = vmatpush2.bf16.msra.mxu0 %v2638_v34  ;;  %1038 = vmatpush2.bf16.msra.mxu1 %v2639_v35  ;;  %v2747_v34 = vld [vmem:[#allocation8 + $0x114] ss:$8 sps:$4 sm:$0xff]   ;;  %v2742_v35 = vld [vmem:[#allocation8 + $0x10] ss:$8 sps:$4 sm:$0xff]   ;;  %s2150_s9 = sshll.u32 %s3270_s29, 4  ;;  %s2117_s28 = scalar_lea.sflag [#allocation12], %s3213_s12  ;;  %s3403_s9 = int_to_ptr.vmem [resolvable:$true] %s2150_s9 }
  0x84   : > { %926 = vmatprep.subr.bf16.mxu0 %v2640_v36  ;;  %1039 = vmatprep.subr.bf16.mxu1 %v2642_v37  ;;  %v2745_v36 = vld [vmem:[#allocation8 + $0x110] ss:$8 sps:$4 sm:$0xff]   ;;  %v2750_v37 = vld [vmem:[#allocation8 + $0x4] ss:$8 sps:$4 sm:$0xff]   ;;  %s2908_s19 = scalar_lea.vmem %s3403_s9, 8192  ;;  %s3036_s10 = smov [#allocation11]  }
  0x85   : > { %p2909_p10 = scmp.ne.s32.totalorder %s3403_s9, %s2908_s19  ;;  %s2912_s16 = sshll.u32 %s3036_s10, 4  ;;  %s2913_s16 = int_to_ptr.vmem [resolvable:$false] %s2912_s16 }
  0x86   : > { %s2914_s11 = scalar_lea.vmem %s2913_s16, 16384  ;;  %p2915_p7 = scmp.lt.s32.totalorder %s3403_s9, %s2913_s16 }
  0x87   : > { %927 = vmatpush2.bf16.msra.mxu0 %v2644_v38  ;;  %1040 = vmatpush2.bf16.msra.mxu1 %v2645_v39  ;;  %v2753_v38 = vld [vmem:[#allocation8 + $0x104] ss:$8 sps:$4 sm:$0xff]   ;;  %v2748_v39 = vld [vmem:[#allocation8] ss:$8 sps:$4 sm:$0xff]   ;;  %p2910_p2 = pnand %p2909_p10, %p3180_p0  ;;  %p2916_p6 = scmp.lt.s32.totalorder %s2914_s11, %s2908_s19 }
  0x88   : > { %928 = vmatprep.subr.bf16.mxu0 %v2646_v40  ;;  %1041 = vmatprep.subr.bf16.mxu1 %v2648_v41  ;;  %v2751_v40 = vld [vmem:[#allocation8 + $0x100] ss:$8 sps:$4 sm:$0xff]   ;;  %v2756_v41 = vld [vmem:[#allocation8 + $0xf4] ss:$8 sps:$4 sm:$0xff]  }
  0x89   : > { %p2911_p11 = pneg %p2910_p2  ;;  %p2917_p9 = por %p2916_p6, %p2915_p7 }
  0x8b   : > { %929 = vmatpush2.bf16.msra.mxu0 %v2650_v42  ;;  %1042 = vmatpush2.bf16.msra.mxu1 %v2651_v43  ;;  %v2759_v42 = vld [vmem:[#allocation8 + $0x1f4] ss:$8 sps:$4 sm:$0xff]   ;;  %p2918_p13 = pnand %p2917_p9, %p2911_p11 }
  0x8c   : > { %930 = vmatprep.subr.bf16.mxu0 %v2652_v44  ;;  %1043 = vmatprep.subr.bf16.mxu1 %v2654_v45  ;;  %v2696_v43 = vld [vmem:[%s3217_s18 + $0x40] ss:$8 sps:$4 sm:$0xff]   ;;  %v2697_v44 = vld [vmem:[%s3217_s18 + $0x54] ss:$8 sps:$4 sm:$0xff]  }
  0x8d   : > { %v2754_v45 = vld [vmem:[#allocation8 + $0xf0] ss:$8 sps:$4 sm:$0xff]  }
  0x8f   : > { %931 = vmatpush2.bf16.msra.mxu0 %v2656_v46  ;;  %1044 = vmatpush2.bf16.msra.mxu1 %v2657_v47  ;;  %v2757_v46 = vld [vmem:[#allocation8 + $0x1f0] ss:$8 sps:$4 sm:$0xff]   ;;  %v2762_v47 = vld [vmem:[#allocation8 + $0xe4] ss:$8 sps:$4 sm:$0xff]  }
  0x90   : > { %932 = vmatprep.subr.bf16.mxu0 %v2658_v49  ;;  %1045 = vmatprep.subr.bf16.mxu1 %v2660_v50  ;;  %v2760_v49 = vld [vmem:[#allocation8 + $0xe0] ss:$8 sps:$4 sm:$0xff]  }
  0x91   : > { %v2763_v50 = vld [vmem:[#allocation8 + $0x1e0] ss:$8 sps:$4 sm:$0xff]  }
  0x93   : > { %933 = vmatpush2.bf16.msra.mxu0 %v2662_v51  ;;  %1046 = vmatpush2.bf16.msra.mxu1 %v2663_v52  ;;  %v2768_v51 = vld [vmem:[#allocation8 + $0xd4] ss:$8 sps:$4 sm:$0xff]  }
  0x94   : > { %934 = vmatprep.subr.bf16.mxu0 %v2664_v53  ;;  %1047 = vmatprep.subr.bf16.mxu1 %v2666_v54  ;;  %v2771_v52 = vld [vmem:[#allocation8 + $0x1d4] ss:$8 sps:$4 sm:$0xff]   ;;  %v2700_v54 = vld [vmem:[%s3217_s18 + $0x64] ss:$8 sps:$4 sm:$0xff]  }
  0x95   : > { %v2699_v53 = vld [vmem:[%s3217_s18 + $0x50] ss:$8 sps:$4 sm:$0xff]  }
  0x97   : > { %935 = vmatpush2.bf16.msra.mxu0 %v2668_v55  ;;  %1048 = vmatpush2.bf16.msra.mxu1 %v2669_v56  ;;  %v2766_v55 = vld [vmem:[#allocation8 + $0xd0] ss:$8 sps:$4 sm:$0xff]  }
  0x98   : > { %936 = vmatprep.subr.bf16.mxu0 %v2670_v57  ;;  %1049 = vmatprep.subr.bf16.mxu1 %v2672_v58  ;;  %v2769_v56 = vld [vmem:[#allocation8 + $0x1d0] ss:$8 sps:$4 sm:$0xff]   ;;  %v2774_v57 = vld [vmem:[#allocation8 + $0xc4] ss:$8 sps:$4 sm:$0xff]  }
  0x99   : > { %v2777_v58 = vld [vmem:[#allocation8 + $0x1c4] ss:$8 sps:$4 sm:$0xff]  }
  0x9b   : > { %937 = vmatpush2.bf16.msra.mxu0 %v2674_v59  ;;  %1050 = vmatpush2.bf16.msra.mxu1 %v2675_v60  ;;  %v2772_v59 = vld [vmem:[#allocation8 + $0xc0] ss:$8 sps:$4 sm:$0xff]  }
  0x9c   : > { %938 = vmatprep.subr.bf16.mxu0 %v2676_v61  ;;  %1051 = vmatprep.subr.bf16.mxu1 %v2678_v62  ;;  %v2775_v60 = vld [vmem:[#allocation8 + $0x1c0] ss:$8 sps:$4 sm:$0xff]   ;;  %v2780_v61 = vld [vmem:[#allocation8 + $0xb4] ss:$8 sps:$4 sm:$0xff]  }
  0x9d   : > { %v2783_v62 = vld [vmem:[#allocation8 + $0x1b4] ss:$8 sps:$4 sm:$0xff]  }
  0x9f   : > { %939 = vmatpush2.bf16.msra.mxu0 %v2680_v63  ;;  %1052 = vmatpush2.bf16.msra.mxu1 %v2681_v0  ;;  %v2702_v63 = vld [vmem:[%s3217_s18 + $0x60] ss:$8 sps:$4 sm:$0xff]   ;;  %v2703_v0 = vld [vmem:[%s3217_s18 + $0x74] ss:$8 sps:$4 sm:$0xff]  }
  0xa0   : > { %1646 = vmatprep.subr.bf16.mxu0 %v2708_v1  ;;  %1759 = vmatprep.subr.bf16.mxu1 %v2711_v2  ;;  %v2778_v1 = vld [vmem:[#allocation8 + $0xb0] ss:$8 sps:$4 sm:$0xff]  }
  0xa1   : > { %v2781_v2 = vld [vmem:[#allocation8 + $0x1b0] ss:$8 sps:$4 sm:$0xff]  }
  0xa2   : > { %941 = vmatmul.mubr.bf16.vlgmr.msra.gmra.mxu0 %v2682_v3  ;;  %1054 = vmatmul.mubr.bf16.vlgmr.msra.gmra.mxu1 %v2682_v3  ;;  %v2705_v3 = vld [vmem:[%s3217_s18 + $0x70] ss:$8 sps:$4 sm:$0xff]  }
  0xa3   : > { %950 = vmatprep.mubr.bf16.mxu0 %v2685_v4  ;;  %1063 = vmatprep.mubr.bf16.mxu1 %v2685_v4  ;;  %v2786_v4 = vld [vmem:[#allocation8 + $0xa4] ss:$8 sps:$4 sm:$0xff]  }
  0xa4   : > { %1647 = vmatpush1.bf16.msra.mxu0 %v2706_v5  ;;  %1760 = vmatpush1.bf16.msra.mxu1 %v2709_v6  ;;  %v2789_v5 = vld [vmem:[#allocation8 + $0x1a4] ss:$8 sps:$4 sm:$0xff]   ;;  %v2784_v6 = vld [vmem:[#allocation8 + $0xa0] ss:$8 sps:$4 sm:$0xff]  }
  0xa5   : > { %1648 = vmatprep.subr.bf16.mxu0 %v2714_v7  ;;  %1761 = vmatprep.subr.bf16.mxu1 %v2717_v8  ;;  %v2787_v7 = vld [vmem:[#allocation8 + $0x1a0] ss:$8 sps:$4 sm:$0xff]   ;;  %v2792_v8 = vld [vmem:[#allocation8 + $0x94] ss:$8 sps:$4 sm:$0xff]  }
  0xa8   : > { %1649 = vmatpush1.bf16.msra.mxu0 %v2712_v9  ;;  %1762 = vmatpush1.bf16.msra.mxu1 %v2715_v10  ;;  %v2795_v9 = vld [vmem:[#allocation8 + $0x194] ss:$8 sps:$4 sm:$0xff]   ;;  %v2790_v10 = vld [vmem:[#allocation8 + $0x90] ss:$8 sps:$4 sm:$0xff]  }
  0xa9   : > { %1650 = vmatprep.subr.bf16.mxu0 %v2720_v11  ;;  %1763 = vmatprep.subr.bf16.mxu1 %v2723_v12  ;;  %v2793_v11 = vld [vmem:[#allocation8 + $0x190] ss:$8 sps:$4 sm:$0xff]   ;;  %v2798_v12 = vld [vmem:[#allocation8 + $0x84] ss:$8 sps:$4 sm:$0xff]  }
  0xaa   : > { %951 = vmatmul.mubr.bf16.gmra.mxu0 %v2687_v13  ;;  %1064 = vmatmul.mubr.bf16.gmra.mxu1 %v2687_v13  ;;  %v2801_v13 = vld [vmem:[#allocation8 + $0x184] ss:$8 sps:$4 sm:$0xff]  }
  0xab   : > { %960 = vmatprep.mubr.bf16.mxu0 %v2688_v14  ;;  %1073 = vmatprep.mubr.bf16.mxu1 %v2688_v14  ;;  %v2796_v14 = vld [vmem:[#allocation8 + $0x80] ss:$8 sps:$4 sm:$0xff]  }
  0xac   : > { %1651 = vmatpush1.bf16.msra.mxu0 %v2718_v15  ;;  %1764 = vmatpush1.bf16.msra.mxu1 %v2721_v16  ;;  %v2799_v15 = vld [vmem:[#allocation8 + $0x180] ss:$8 sps:$4 sm:$0xff]   ;;  %v488_v16 = vlaneseq }
  0xad   : > { %1652 = vmatprep.subr.bf16.mxu0 %v2726_v17  ;;  %1765 = vmatprep.subr.bf16.mxu1 %v2729_v18 }
  0xae   : > { %v3247_v17 = vshrl.u32 %v488_v16, 7 }
  0xb0   : > { %1653 = vmatpush1.bf16.msra.mxu0 %v2724_v19  ;;  %1766 = vmatpush1.bf16.msra.mxu1 %v2727_v20  ;;  %v490_v18 = vsub.s32 0, %v3247_v17  ;;  %v498_v19 = vsub.s32 2, %v3247_v17  ;;  %v486_v20 = vld [vmem:[#allocation7] sm:$0xf] }
  0xb1   : > { %1654 = vmatprep.subr.bf16.mxu0 %v2732_v21  ;;  %1767 = vmatprep.subr.bf16.mxu1 %v2735_v22  ;;  %v494_v21 = vsub.s32 1, %v3247_v17  ;;  %v502_v22 = vsub.s32 3, %v3247_v17 }
  0xb2   : > { %961 = vmatmul.mubr.bf16.gmra.mxu0 %v2690_v23  ;;  %1074 = vmatmul.mubr.bf16.gmra.mxu1 %v2690_v23  ;;  %v3255_v23 = vrot.slane %v486_v20, %v490_v18 }
  0xb3   : > { %970 = vmatprep.mubr.bf16.mxu0 %v2691_v24  ;;  %1083 = vmatprep.mubr.bf16.mxu1 %v2691_v24  ;;  %v3257_v24 = vrot.slane %v486_v20, %v498_v19 }
  0xb4   : > { %1655 = vmatpush1.bf16.msra.mxu0 %v2730_v25  ;;  %1768 = vmatpush1.bf16.msra.mxu1 %v2733_v26  ;;  %v3262_v25 = vrot.slane %v486_v20, %v494_v21  ;;  %v3264_v26 = vrot.slane %v486_v20, %v502_v22 }
  0xb5   : > { %1656 = vmatprep.subr.bf16.mxu0 %v2738_v27  ;;  %1769 = vmatprep.subr.bf16.mxu1 %v2741_v28 }
  0xb8   : > { %1657 = vmatpush1.bf16.msra.mxu0 %v2736_v29  ;;  %1770 = vmatpush1.bf16.msra.mxu1 %v2739_v31 }
  0xb9   : > { %1658 = vmatprep.subr.bf16.mxu0 %v2744_v33  ;;  %1771 = vmatprep.subr.bf16.mxu1 %v2747_v34 }
  0xba   : > { %971 = vmatmul.mubr.bf16.gmra.mxu0 %v2693_v30  ;;  %1084 = vmatmul.mubr.bf16.gmra.mxu1 %v2693_v30 }
  0xbb   : > { %980 = vmatprep.mubr.bf16.mxu0 %v2694_v32  ;;  %1093 = vmatprep.mubr.bf16.mxu1 %v2694_v32 }
  0xbc   : > { %1659 = vmatpush1.bf16.msra.mxu0 %v2742_v35  ;;  %1772 = vmatpush1.bf16.msra.mxu1 %v2745_v36 }
  0xbd   : > { %1660 = vmatprep.subr.bf16.mxu0 %v2750_v37  ;;  %1773 = vmatprep.subr.bf16.mxu1 %v2753_v38 }
  0xc0   : > { %1661 = vmatpush1.bf16.msra.mxu0 %v2748_v39  ;;  %1774 = vmatpush1.bf16.msra.mxu1 %v2751_v40 }
  0xc1   : > { %1662 = vmatprep.subr.bf16.mxu0 %v2756_v41  ;;  %1775 = vmatprep.subr.bf16.mxu1 %v2759_v42 }
  0xc2   : > { %981 = vmatmul.mubr.bf16.gmra.mxu0 %v2696_v43  ;;  %1094 = vmatmul.mubr.bf16.gmra.mxu1 %v2696_v43 }
  0xc3   : > { %990 = vmatprep.mubr.bf16.mxu0 %v2697_v44  ;;  %1103 = vmatprep.mubr.bf16.mxu1 %v2697_v44 }
  0xc4   : > { %1663 = vmatpush2.bf16.msra.mxu0 %v2754_v45  ;;  %1776 = vmatpush2.bf16.msra.mxu1 %v2757_v46 }
  0xc5   : > { %1664 = vmatprep.subr.bf16.mxu0 %v2762_v47  ;;  %1777 = vmatprep.subr.bf16.mxu1 %v2765_v48 }
  0xc8   : > { %1665 = vmatpush2.bf16.msra.mxu0 %v2760_v49  ;;  %1778 = vmatpush2.bf16.msra.mxu1 %v2763_v50 }
  0xc9   : > { %1666 = vmatprep.subr.bf16.mxu0 %v2768_v51  ;;  %1779 = vmatprep.subr.bf16.mxu1 %v2771_v52 }
  0xca   : > { %991 = vmatmul.mubr.bf16.gmra.mxu0 %v2699_v53  ;;  %1104 = vmatmul.mubr.bf16.gmra.mxu1 %v2699_v53 }
  0xcb   : > { %1000 = vmatprep.mubr.bf16.mxu0 %v2700_v54  ;;  %1113 = vmatprep.mubr.bf16.mxu1 %v2700_v54 }
  0xcc   : > { %1667 = vmatpush2.bf16.msra.mxu0 %v2766_v55  ;;  %1780 = vmatpush2.bf16.msra.mxu1 %v2769_v56 }
  0xcd   : > { %1668 = vmatprep.subr.bf16.mxu0 %v2774_v57  ;;  %1781 = vmatprep.subr.bf16.mxu1 %v2777_v58 }
  0xd0   : > { %1669 = vmatpush2.bf16.msra.mxu0 %v2772_v59  ;;  %1782 = vmatpush2.bf16.msra.mxu1 %v2775_v60 }
  0xd1   : > { %1670 = vmatprep.subr.bf16.mxu0 %v2780_v61  ;;  %1783 = vmatprep.subr.bf16.mxu1 %v2783_v62 }
  0xd2   : > { %1001 = vmatmul.mubr.bf16.gmra.mxu0 %v2702_v63  ;;  %1114 = vmatmul.mubr.bf16.gmra.mxu1 %v2702_v63 }
  0xd3   : > { %1010 = vmatprep.mubr.bf16.mxu0 %v2703_v0  ;;  %1123 = vmatprep.mubr.bf16.mxu1 %v2703_v0 }
  0xd4   : > { %1671 = vmatpush2.bf16.msra.mxu0 %v2778_v1  ;;  %1784 = vmatpush2.bf16.msra.mxu1 %v2781_v2 }
  0xd5   : > { %1672 = vmatprep.subr.bf16.mxu0 %v2786_v4  ;;  %1785 = vmatprep.subr.bf16.mxu1 %v2789_v5 }
  0xd8   : > { %1673 = vmatpush2.bf16.msra.mxu0 %v2784_v6  ;;  %1786 = vmatpush2.bf16.msra.mxu1 %v2787_v7 }
  0xd9   : > { %1674 = vmatprep.subr.bf16.mxu0 %v2792_v8  ;;  %1787 = vmatprep.subr.bf16.mxu1 %v2795_v9 }
  0xda   : > { %1011 = vmatmul.mubr.bf16.gmra.mxu0 %v2705_v3  ;;  %1124 = vmatmul.mubr.bf16.gmra.mxu1 %v2705_v3 }
  0xdc   : > { %1675 = vmatpush2.bf16.msra.mxu0 %v2790_v10  ;;  %1788 = vmatpush2.bf16.msra.mxu1 %v2793_v11 }
  0xdd   : > { %1676 = vmatprep.subr.bf16.mxu0 %v2798_v12  ;;  %1789 = vmatprep.subr.bf16.mxu1 %v2801_v13 }
  0xe0   : > { %1677 = vmatpush2.bf16.msra.mxu0 %v2796_v14  ;;  %1790 = vmatpush2.bf16.msra.mxu1 %v2799_v15 }
 0x162   : > { %v942_v27 = vpop.f32.mrf.mxu0  ;;  %v1055_v28 = vpop.f32.mrf.mxu1 }
 0x163   : > { %v943_v29 = vadd.f32 %v942_v27, %v3255_v23  ;;  %v1056_v30 = vadd.f32 %v1055_v28, %v3257_v24 }
 0x164   : > { %v944_v31 = vpop.f32.mrf.mxu0  ;;  %v1057_v32 = vpop.f32.mrf.mxu1 }
 0x165   : > { %v1134_v33 = vmax.f32 %v943_v29, 0.0  ;;  %v1136_v34 = vmax.f32 %v1056_v30, 0.0  ;;  %v945_v35 = vadd.f32 %v944_v31, %v3262_v25  ;;  %v1058_v36 = vadd.f32 %v1057_v32, %v3264_v26 }
 0x166   : > { %v946_v37 = vpop.f32.mrf.mxu0  ;;  %v1059_v38 = vpop.f32.mrf.mxu1 }
 0x167   : > { %1936 = vst [vmem:[%s3270_s29] sm:$0xff] %v1134_v33  ;;  %1938 = vst [vmem:[%s3270_s29 + $0x10] sm:$0xff] %v1136_v34  ;;  %v1135_v39 = vmax.f32 %v945_v35, 0.0  ;;  %v1137_v40 = vmax.f32 %v1058_v36, 0.0  ;;  %v947_v41 = vadd.f32 %v946_v37, %v3255_v23  ;;  %v1060_v42 = vadd.f32 %v1059_v38, %v3257_v24 }
 0x168   : > { %v948_v43 = vpop.f32.mrf.mxu0  ;;  %v1061_v44 = vpop.f32.mrf.mxu1 }
 0x169   : > { %1937 = vst [vmem:[%s3270_s29 + $0x8] sm:$0xff] %v1135_v39  ;;  %1939 = vst [vmem:[%s3270_s29 + $0x18] sm:$0xff] %v1137_v40  ;;  %v1138_v45 = vmax.f32 %v947_v41, 0.0  ;;  %v1140_v46 = vmax.f32 %v1060_v42, 0.0  ;;  %v949_v47 = vadd.f32 %v948_v43, %v3262_v25  ;;  %v1062_v48 = vadd.f32 %v1061_v44, %v3264_v26 }
 0x16a   : > { %v952_v49 = vpop.f32.mrf.mxu0  ;;  %v1065_v50 = vpop.f32.mrf.mxu1 }
 0x16b   : > { %1940 = vst [vmem:[%s3270_s29 + $0x20] sm:$0xff] %v1138_v45  ;;  %1942 = vst [vmem:[%s3270_s29 + $0x30] sm:$0xff] %v1140_v46  ;;  %v1139_v51 = vmax.f32 %v949_v47, 0.0  ;;  %v1141_v52 = vmax.f32 %v1062_v48, 0.0  ;;  %v953_v53 = vadd.f32 %v952_v49, %v3255_v23  ;;  %v1066_v54 = vadd.f32 %v1065_v50, %v3257_v24 }
 0x16c   : > { %v954_v55 = vpop.f32.mrf.mxu0  ;;  %v1067_v56 = vpop.f32.mrf.mxu1  ;;  %v1230_v61 = vpack.c.bf16 %v1138_v45, %v1134_v33  ;;  %v1232_v62 = vpack.c.bf16 %v1140_v46, %v1136_v34 }
 0x16d   : > { %v1231_v57 = vpack.c.bf16 %v1139_v51, %v1135_v39  ;;  %1941 = vst [vmem:[%s3270_s29 + $0x28] sm:$0xff] %v1139_v51  ;;  %v1233_v58 = vpack.c.bf16 %v1141_v52, %v1137_v40  ;;  %1943 = vst [vmem:[%s3270_s29 + $0x38] sm:$0xff] %v1141_v52  ;;  %v955_v59 = vadd.f32 %v954_v55, %v3262_v25  ;;  %v1142_v63 = vmax.f32 %v953_v53, 0.0 }
 0x16e   : > { %v1068_v60 = vadd.f32 %v1067_v56, %v3264_v26  ;;  %v1144_v0 = vmax.f32 %v1066_v54, 0.0  ;;  %v956_v1 = vpop.f32.mrf.mxu0  ;;  %v1069_v2 = vpop.f32.mrf.mxu1 }
 0x16f   : > { %v1143_v3 = vmax.f32 %v955_v59, 0.0  ;;  %v957_v5 = vadd.f32 %v956_v1, %v3255_v23  ;;  %v1070_v6 = vadd.f32 %v1069_v2, %v3257_v24  ;;  %1678 = vmatprep.mubr.bf16.mxu0 %v1231_v57  ;;  %1791 = vmatprep.mubr.bf16.mxu1 %v1233_v58  ;;  %1944 = vst [vmem:[%s3270_s29 + $0x40] sm:$0xff] %v1142_v63 }
 0x170   : > { %v1145_v4 = vmax.f32 %v1068_v60, 0.0  ;;  %1946 = vst [vmem:[%s3270_s29 + $0x50] sm:$0xff] %v1144_v0  ;;  %v958_v7 = vpop.f32.mrf.mxu0  ;;  %v1071_v8 = vpop.f32.mrf.mxu1  ;;  %1679 = vmatmul.mubr.bf16.vlgmr.msra.gmra.mxu0 %v1230_v61  ;;  %1792 = vmatmul.mubr.bf16.vlgmr.msra.gmra.mxu1 %v1232_v62 }
 0x171   : > { %1945 = vst [vmem:[%s3270_s29 + $0x48] sm:$0xff] %v1143_v3  ;;  %v1146_v9 = vmax.f32 %v957_v5, 0.0  ;;  %v1148_v10 = vmax.f32 %v1070_v6, 0.0  ;;  %v959_v11 = vadd.f32 %v958_v7, %v3262_v25  ;;  %v1072_v12 = vadd.f32 %v1071_v8, %v3264_v26 }
 0x172   : > { %1947 = vst [vmem:[%s3270_s29 + $0x58] sm:$0xff] %v1145_v4  ;;  %v962_v13 = vpop.f32.mrf.mxu0  ;;  %v1075_v14 = vpop.f32.mrf.mxu1 }
 0x173   : > { %1948 = vst [vmem:[%s3270_s29 + $0x60] sm:$0xff] %v1146_v9  ;;  %1950 = vst [vmem:[%s3270_s29 + $0x70] sm:$0xff] %v1148_v10  ;;  %v1147_v15 = vmax.f32 %v959_v11, 0.0  ;;  %v1149_v16 = vmax.f32 %v1072_v12, 0.0  ;;  %v963_v19 = vadd.f32 %v962_v13, %v3255_v23  ;;  %v1076_v20 = vadd.f32 %v1075_v14, %v3257_v24 }
 0x174   : > { %v964_v22 = vpop.f32.mrf.mxu0  ;;  %v1077_v27 = vpop.f32.mrf.mxu1  ;;  %v1234_v32 = vpack.c.bf16 %v1146_v9, %v1142_v63  ;;  %v1236_v33 = vpack.c.bf16 %v1148_v10, %v1144_v0 }
 0x175   : > { %v1235_v28 = vpack.c.bf16 %v1147_v15, %v1143_v3  ;;  %1949 = vst [vmem:[%s3270_s29 + $0x68] sm:$0xff] %v1147_v15  ;;  %v1237_v29 = vpack.c.bf16 %v1149_v16, %v1145_v4  ;;  %1951 = vst [vmem:[%s3270_s29 + $0x78] sm:$0xff] %v1149_v16  ;;  %v965_v30 = vadd.f32 %v964_v22, %v3262_v25  ;;  %v1150_v34 = vmax.f32 %v963_v19, 0.0 }
 0x176   : > { %v1078_v31 = vadd.f32 %v1077_v27, %v3264_v26  ;;  %v1152_v35 = vmax.f32 %v1076_v20, 0.0  ;;  %v966_v36 = vpop.f32.mrf.mxu0  ;;  %v1079_v37 = vpop.f32.mrf.mxu1 }
 0x177   : > { %v1151_v38 = vmax.f32 %v965_v30, 0.0  ;;  %v967_v40 = vadd.f32 %v966_v36, %v3255_v23  ;;  %v1080_v41 = vadd.f32 %v1079_v37, %v3257_v24  ;;  %1688 = vmatprep.mubr.bf16.mxu0 %v1235_v28  ;;  %1801 = vmatprep.mubr.bf16.mxu1 %v1237_v29  ;;  %1952 = vst [vmem:[%s3270_s29 + $0x80] sm:$0xff] %v1150_v34 }
 0x178   : > { %v1153_v39 = vmax.f32 %v1078_v31, 0.0  ;;  %1954 = vst [vmem:[%s3270_s29 + $0x90] sm:$0xff] %v1152_v35  ;;  %v968_v42 = vpop.f32.mrf.mxu0  ;;  %v1081_v43 = vpop.f32.mrf.mxu1  ;;  %1689 = vmatmul.mubr.bf16.gmra.mxu0 %v1234_v32  ;;  %1802 = vmatmul.mubr.bf16.gmra.mxu1 %v1236_v33 }
 0x179   : > { %1953 = vst [vmem:[%s3270_s29 + $0x88] sm:$0xff] %v1151_v38  ;;  %v1154_v44 = vmax.f32 %v967_v40, 0.0  ;;  %v1156_v45 = vmax.f32 %v1080_v41, 0.0  ;;  %v969_v46 = vadd.f32 %v968_v42, %v3262_v25  ;;  %v1082_v47 = vadd.f32 %v1081_v43, %v3264_v26 }
 0x17a   : > { %1955 = vst [vmem:[%s3270_s29 + $0x98] sm:$0xff] %v1153_v39  ;;  %v972_v48 = vpop.f32.mrf.mxu0  ;;  %v1085_v49 = vpop.f32.mrf.mxu1 }
 0x17b   : > { %1956 = vst [vmem:[%s3270_s29 + $0xa0] sm:$0xff] %v1154_v44  ;;  %1958 = vst [vmem:[%s3270_s29 + $0xb0] sm:$0xff] %v1156_v45  ;;  %v1155_v50 = vmax.f32 %v969_v46, 0.0  ;;  %v1157_v51 = vmax.f32 %v1082_v47, 0.0  ;;  %v973_v52 = vadd.f32 %v972_v48, %v3255_v23  ;;  %v1086_v53 = vadd.f32 %v1085_v49, %v3257_v24 }
 0x17c   : > { %v974_v54 = vpop.f32.mrf.mxu0  ;;  %v1087_v55 = vpop.f32.mrf.mxu1  ;;  %v1238_v60 = vpack.c.bf16 %v1154_v44, %v1150_v34  ;;  %v1240_v61 = vpack.c.bf16 %v1156_v45, %v1152_v35 }
 0x17d   : > { %v1239_v56 = vpack.c.bf16 %v1155_v50, %v1151_v38  ;;  %1957 = vst [vmem:[%s3270_s29 + $0xa8] sm:$0xff] %v1155_v50  ;;  %v1241_v57 = vpack.c.bf16 %v1157_v51, %v1153_v39  ;;  %1959 = vst [vmem:[%s3270_s29 + $0xb8] sm:$0xff] %v1157_v51  ;;  %v975_v58 = vadd.f32 %v974_v54, %v3262_v25  ;;  %v1158_v62 = vmax.f32 %v973_v52, 0.0 }
 0x17e   : > { %v1088_v59 = vadd.f32 %v1087_v55, %v3264_v26  ;;  %v1160_v63 = vmax.f32 %v1086_v53, 0.0  ;;  %v976_v0 = vpop.f32.mrf.mxu0  ;;  %v1089_v1 = vpop.f32.mrf.mxu1 }
 0x17f   : > { %v1159_v2 = vmax.f32 %v975_v58, 0.0  ;;  %v977_v4 = vadd.f32 %v976_v0, %v3255_v23  ;;  %v1090_v5 = vadd.f32 %v1089_v1, %v3257_v24  ;;  %1698 = vmatprep.mubr.bf16.mxu0 %v1239_v56  ;;  %1811 = vmatprep.mubr.bf16.mxu1 %v1241_v57  ;;  %1960 = vst [vmem:[%s3270_s29 + $0xc0] sm:$0xff] %v1158_v62 }
 0x180   : > { %v1161_v3 = vmax.f32 %v1088_v59, 0.0  ;;  %1962 = vst [vmem:[%s3270_s29 + $0xd0] sm:$0xff] %v1160_v63  ;;  %v978_v6 = vpop.f32.mrf.mxu0  ;;  %v1091_v7 = vpop.f32.mrf.mxu1  ;;  %1699 = vmatmul.mubr.bf16.gmra.mxu0 %v1238_v60  ;;  %1812 = vmatmul.mubr.bf16.gmra.mxu1 %v1240_v61 }
 0x181   : > { %1961 = vst [vmem:[%s3270_s29 + $0xc8] sm:$0xff] %v1159_v2  ;;  %v1162_v8 = vmax.f32 %v977_v4, 0.0  ;;  %v1164_v9 = vmax.f32 %v1090_v5, 0.0  ;;  %v979_v10 = vadd.f32 %v978_v6, %v3262_v25  ;;  %v1092_v11 = vadd.f32 %v1091_v7, %v3264_v26 }
 0x182   : > { %1963 = vst [vmem:[%s3270_s29 + $0xd8] sm:$0xff] %v1161_v3  ;;  %v982_v12 = vpop.f32.mrf.mxu0  ;;  %v1095_v13 = vpop.f32.mrf.mxu1 }
 0x183   : > { %1964 = vst [vmem:[%s3270_s29 + $0xe0] sm:$0xff] %v1162_v8  ;;  %1966 = vst [vmem:[%s3270_s29 + $0xf0] sm:$0xff] %v1164_v9  ;;  %v1163_v14 = vmax.f32 %v979_v10, 0.0  ;;  %v1165_v15 = vmax.f32 %v1092_v11, 0.0  ;;  %v983_v16 = vadd.f32 %v982_v12, %v3255_v23  ;;  %v1096_v19 = vadd.f32 %v1095_v13, %v3257_v24 }
 0x184   : > { %v984_v20 = vpop.f32.mrf.mxu0  ;;  %v1097_v22 = vpop.f32.mrf.mxu1  ;;  %v1242_v31 = vpack.c.bf16 %v1162_v8, %v1158_v62  ;;  %v1244_v32 = vpack.c.bf16 %v1164_v9, %v1160_v63 }
 0x185   : > { %v1243_v27 = vpack.c.bf16 %v1163_v14, %v1159_v2  ;;  %1965 = vst [vmem:[%s3270_s29 + $0xe8] sm:$0xff] %v1163_v14  ;;  %v1245_v28 = vpack.c.bf16 %v1165_v15, %v1161_v3  ;;  %1967 = vst [vmem:[%s3270_s29 + $0xf8] sm:$0xff] %v1165_v15  ;;  %v985_v29 = vadd.f32 %v984_v20, %v3262_v25  ;;  %v1166_v33 = vmax.f32 %v983_v16, 0.0 }
 0x186   : > { %v1098_v30 = vadd.f32 %v1097_v22, %v3264_v26  ;;  %v1168_v34 = vmax.f32 %v1096_v19, 0.0  ;;  %v986_v35 = vpop.f32.mrf.mxu0  ;;  %v1099_v36 = vpop.f32.mrf.mxu1 }
 0x187   : > { %v1167_v37 = vmax.f32 %v985_v29, 0.0  ;;  %v987_v39 = vadd.f32 %v986_v35, %v3255_v23  ;;  %v1100_v40 = vadd.f32 %v1099_v36, %v3257_v24  ;;  %1708 = vmatprep.mubr.bf16.mxu0 %v1243_v27  ;;  %1821 = vmatprep.mubr.bf16.mxu1 %v1245_v28  ;;  %1968 = vst [vmem:[%s3270_s29 + $0x100] sm:$0xff] %v1166_v33 }
 0x188   : > { %v1169_v38 = vmax.f32 %v1098_v30, 0.0  ;;  %1970 = vst [vmem:[%s3270_s29 + $0x110] sm:$0xff] %v1168_v34  ;;  %v988_v41 = vpop.f32.mrf.mxu0  ;;  %v1101_v42 = vpop.f32.mrf.mxu1  ;;  %1709 = vmatmul.mubr.bf16.gmra.mxu0 %v1242_v31  ;;  %1822 = vmatmul.mubr.bf16.gmra.mxu1 %v1244_v32 }
 0x189   : > { %1969 = vst [vmem:[%s3270_s29 + $0x108] sm:$0xff] %v1167_v37  ;;  %v1170_v43 = vmax.f32 %v987_v39, 0.0  ;;  %v1172_v44 = vmax.f32 %v1100_v40, 0.0  ;;  %v989_v45 = vadd.f32 %v988_v41, %v3262_v25  ;;  %v1102_v46 = vadd.f32 %v1101_v42, %v3264_v26 }
 0x18a   : > { %1971 = vst [vmem:[%s3270_s29 + $0x118] sm:$0xff] %v1169_v38  ;;  %v992_v47 = vpop.f32.mrf.mxu0  ;;  %v1105_v48 = vpop.f32.mrf.mxu1 }
 0x18b   : > { %1972 = vst [vmem:[%s3270_s29 + $0x120] sm:$0xff] %v1170_v43  ;;  %1974 = vst [vmem:[%s3270_s29 + $0x130] sm:$0xff] %v1172_v44  ;;  %v1171_v49 = vmax.f32 %v989_v45, 0.0  ;;  %v1173_v50 = vmax.f32 %v1102_v46, 0.0  ;;  %v993_v51 = vadd.f32 %v992_v47, %v3255_v23  ;;  %v1106_v52 = vadd.f32 %v1105_v48, %v3257_v24 }
 0x18c   : > { %v994_v53 = vpop.f32.mrf.mxu0  ;;  %v1107_v54 = vpop.f32.mrf.mxu1  ;;  %v1246_v59 = vpack.c.bf16 %v1170_v43, %v1166_v33  ;;  %v1248_v60 = vpack.c.bf16 %v1172_v44, %v1168_v34 }
 0x18d   : > { %v1247_v55 = vpack.c.bf16 %v1171_v49, %v1167_v37  ;;  %1973 = vst [vmem:[%s3270_s29 + $0x128] sm:$0xff] %v1171_v49  ;;  %v1249_v56 = vpack.c.bf16 %v1173_v50, %v1169_v38  ;;  %1975 = vst [vmem:[%s3270_s29 + $0x138] sm:$0xff] %v1173_v50  ;;  %v995_v57 = vadd.f32 %v994_v53, %v3262_v25  ;;  %v1174_v61 = vmax.f32 %v993_v51, 0.0 }
 0x18e   : > { %v1108_v58 = vadd.f32 %v1107_v54, %v3264_v26  ;;  %v1176_v62 = vmax.f32 %v1106_v52, 0.0  ;;  %v996_v63 = vpop.f32.mrf.mxu0  ;;  %v1109_v0 = vpop.f32.mrf.mxu1 }
 0x18f   : > { %v1175_v1 = vmax.f32 %v995_v57, 0.0  ;;  %v997_v3 = vadd.f32 %v996_v63, %v3255_v23  ;;  %v1110_v4 = vadd.f32 %v1109_v0, %v3257_v24  ;;  %1718 = vmatprep.mubr.bf16.mxu0 %v1247_v55  ;;  %1831 = vmatprep.mubr.bf16.mxu1 %v1249_v56  ;;  %1976 = vst [vmem:[%s3270_s29 + $0x140] sm:$0xff] %v1174_v61 }
 0x190   : > { %v1177_v2 = vmax.f32 %v1108_v58, 0.0  ;;  %1978 = vst [vmem:[%s3270_s29 + $0x150] sm:$0xff] %v1176_v62  ;;  %v998_v5 = vpop.f32.mrf.mxu0  ;;  %v1111_v6 = vpop.f32.mrf.mxu1  ;;  %1719 = vmatmul.mubr.bf16.gmra.mxu0 %v1246_v59  ;;  %1832 = vmatmul.mubr.bf16.gmra.mxu1 %v1248_v60 }
 0x191   : > { %1977 = vst [vmem:[%s3270_s29 + $0x148] sm:$0xff] %v1175_v1  ;;  %v1178_v7 = vmax.f32 %v997_v3, 0.0  ;;  %v1180_v8 = vmax.f32 %v1110_v4, 0.0  ;;  %v999_v9 = vadd.f32 %v998_v5, %v3262_v25  ;;  %v1112_v10 = vadd.f32 %v1111_v6, %v3264_v26 }
 0x192   : > { %1979 = vst [vmem:[%s3270_s29 + $0x158] sm:$0xff] %v1177_v2  ;;  %v1002_v11 = vpop.f32.mrf.mxu0  ;;  %v1115_v12 = vpop.f32.mrf.mxu1 }
 0x193   : > { %1980 = vst [vmem:[%s3270_s29 + $0x160] sm:$0xff] %v1178_v7  ;;  %1982 = vst [vmem:[%s3270_s29 + $0x170] sm:$0xff] %v1180_v8  ;;  %v1179_v13 = vmax.f32 %v999_v9, 0.0  ;;  %v1181_v14 = vmax.f32 %v1112_v10, 0.0  ;;  %v1003_v15 = vadd.f32 %v1002_v11, %v3255_v23  ;;  %v1116_v16 = vadd.f32 %v1115_v12, %v3257_v24 }
 0x194   : > { %v1004_v19 = vpop.f32.mrf.mxu0  ;;  %v1117_v20 = vpop.f32.mrf.mxu1  ;;  %v1250_v30 = vpack.c.bf16 %v1178_v7, %v1174_v61  ;;  %v1252_v31 = vpack.c.bf16 %v1180_v8, %v1176_v62 }
 0x195   : > { %v1251_v22 = vpack.c.bf16 %v1179_v13, %v1175_v1  ;;  %1981 = vst [vmem:[%s3270_s29 + $0x168] sm:$0xff] %v1179_v13  ;;  %v1253_v27 = vpack.c.bf16 %v1181_v14, %v1177_v2  ;;  %1983 = vst [vmem:[%s3270_s29 + $0x178] sm:$0xff] %v1181_v14  ;;  %v1005_v28 = vadd.f32 %v1004_v19, %v3262_v25  ;;  %v1182_v32 = vmax.f32 %v1003_v15, 0.0 }
 0x196   : > { %v1118_v29 = vadd.f32 %v1117_v20, %v3264_v26  ;;  %v1184_v33 = vmax.f32 %v1116_v16, 0.0  ;;  %v1006_v34 = vpop.f32.mrf.mxu0  ;;  %v1119_v35 = vpop.f32.mrf.mxu1 }
 0x197   : > { %v1183_v36 = vmax.f32 %v1005_v28, 0.0  ;;  %v1007_v38 = vadd.f32 %v1006_v34, %v3255_v23  ;;  %v1120_v39 = vadd.f32 %v1119_v35, %v3257_v24  ;;  %1728 = vmatprep.mubr.bf16.mxu0 %v1251_v22  ;;  %1841 = vmatprep.mubr.bf16.mxu1 %v1253_v27  ;;  %1984 = vst [vmem:[%s3270_s29 + $0x180] sm:$0xff] %v1182_v32 }
 0x198   : > { %v1185_v37 = vmax.f32 %v1118_v29, 0.0  ;;  %1986 = vst [vmem:[%s3270_s29 + $0x190] sm:$0xff] %v1184_v33  ;;  %v1008_v40 = vpop.f32.mrf.mxu0  ;;  %v1121_v41 = vpop.f32.mrf.mxu1  ;;  %1729 = vmatmul.mubr.bf16.gmra.mxu0 %v1250_v30  ;;  %1842 = vmatmul.mubr.bf16.gmra.mxu1 %v1252_v31 }
 0x199   : > { %1985 = vst [vmem:[%s3270_s29 + $0x188] sm:$0xff] %v1183_v36  ;;  %v1186_v42 = vmax.f32 %v1007_v38, 0.0  ;;  %v1188_v43 = vmax.f32 %v1120_v39, 0.0  ;;  %v1009_v44 = vadd.f32 %v1008_v40, %v3262_v25  ;;  %v1122_v45 = vadd.f32 %v1121_v41, %v3264_v26 }
 0x19a   : > { %1987 = vst [vmem:[%s3270_s29 + $0x198] sm:$0xff] %v1185_v37  ;;  %v1012_v46 = vpop.f32.mrf.mxu0  ;;  %v1125_v47 = vpop.f32.mrf.mxu1 }
 0x19b   : > { %1988 = vst [vmem:[%s3270_s29 + $0x1a0] sm:$0xff] %v1186_v42  ;;  %1990 = vst [vmem:[%s3270_s29 + $0x1b0] sm:$0xff] %v1188_v43  ;;  %v1187_v48 = vmax.f32 %v1009_v44, 0.0  ;;  %v1189_v49 = vmax.f32 %v1122_v45, 0.0  ;;  %v1013_v50 = vadd.f32 %v1012_v46, %v3255_v23  ;;  %v1126_v51 = vadd.f32 %v1125_v47, %v3257_v24 }
 0x19c   : > { %v1014_v52 = vpop.f32.mrf.mxu0  ;;  %v1127_v53 = vpop.f32.mrf.mxu1  ;;  %v1254_v58 = vpack.c.bf16 %v1186_v42, %v1182_v32  ;;  %v1256_v59 = vpack.c.bf16 %v1188_v43, %v1184_v33 }
 0x19d   : > { %v1255_v54 = vpack.c.bf16 %v1187_v48, %v1183_v36  ;;  %1989 = vst [vmem:[%s3270_s29 + $0x1a8] sm:$0xff] %v1187_v48  ;;  %v1257_v55 = vpack.c.bf16 %v1189_v49, %v1185_v37  ;;  %1991 = vst [vmem:[%s3270_s29 + $0x1b8] sm:$0xff] %v1189_v49  ;;  %v1015_v56 = vadd.f32 %v1014_v52, %v3262_v25  ;;  %v1190_v60 = vmax.f32 %v1013_v50, 0.0 }
 0x19e   : > { %v1128_v57 = vadd.f32 %v1127_v53, %v3264_v26  ;;  %v1192_v61 = vmax.f32 %v1126_v51, 0.0  ;;  %v1016_v62 = vpop.f32.mrf.mxu0  ;;  %v1129_v63 = vpop.f32.mrf.mxu1 }
 0x19f   : > { %v1191_v0 = vmax.f32 %v1015_v56, 0.0  ;;  %v1017_v2 = vadd.f32 %v1016_v62, %v3255_v23  ;;  %v1130_v3 = vadd.f32 %v1129_v63, %v3257_v24  ;;  %1738 = vmatprep.mubr.bf16.mxu0 %v1255_v54  ;;  %1851 = vmatprep.mubr.bf16.mxu1 %v1257_v55  ;;  %1992 = vst [vmem:[%s3270_s29 + $0x1c0] sm:$0xff] %v1190_v60 }
 0x1a0   : > { %v1193_v1 = vmax.f32 %v1128_v57, 0.0  ;;  %1994 = vst [vmem:[%s3270_s29 + $0x1d0] sm:$0xff] %v1192_v61  ;;  %v1018_v4 = vpop.f32.mrf.mxu0  ;;  %v1131_v5 = vpop.f32.mrf.mxu1  ;;  %1739 = vmatmul.mubr.bf16.gmra.mxu0 %v1254_v58  ;;  %1852 = vmatmul.mubr.bf16.gmra.mxu1 %v1256_v59 }
 0x1a1   : > { %1993 = vst [vmem:[%s3270_s29 + $0x1c8] sm:$0xff] %v1191_v0  ;;  %v1194_v6 = vmax.f32 %v1017_v2, 0.0  ;;  %v1196_v7 = vmax.f32 %v1130_v3, 0.0  ;;  %v1019_v23 = vadd.f32 %v1018_v4, %v3262_v25  ;;  %v1132_v24 = vadd.f32 %v1131_v5, %v3264_v26 }
 0x1a2   : > { %1995 = vst [vmem:[%s3270_s29 + $0x1d8] sm:$0xff] %v1193_v1 }
 0x1a3   : > { %1996 = vst [vmem:[%s3270_s29 + $0x1e0] sm:$0xff] %v1194_v6  ;;  %1998 = vst [vmem:[%s3270_s29 + $0x1f0] sm:$0xff] %v1196_v7  ;;  %v1195_v8 = vmax.f32 %v1019_v23, 0.0  ;;  %v1197_v9 = vmax.f32 %v1132_v24, 0.0  ;;  %v1258_v12 = vpack.c.bf16 %v1194_v6, %v1190_v60  ;;  %v1260_v13 = vpack.c.bf16 %v1196_v7, %v1192_v61 }
 0x1a5   : > { %v1259_v10 = vpack.c.bf16 %v1195_v8, %v1191_v0  ;;  %1997 = vst [vmem:[%s3270_s29 + $0x1e8] sm:$0xff] %v1195_v8  ;;  %v1261_v11 = vpack.c.bf16 %v1197_v9, %v1193_v1  ;;  %1999 = vst [vmem:[%s3270_s29 + $0x1f8] sm:$0xff] %v1197_v9 }
 0x1a7   : > { %1748 = vmatprep.mubr.bf16.mxu0 %v1259_v10  ;;  %1861 = vmatprep.mubr.bf16.mxu1 %v1261_v11 }
 0x1a8   : > { %1749 = vmatmul.mubr.bf16.gmra.mxu0 %v1258_v12  ;;  %1862 = vmatmul.mubr.bf16.gmra.mxu1 %v1260_v13 }
 0x1a9   : > { %2921 = shalt.err (!%p2918_p13)
}
 0x1aa   : > { %s2922_s2 = scalar_lea.hbm %s3401_s30, 8192  ;;  %s2926_s1 = scalar_lea.hbm %s3567_s6, 16384 }
 0x1ab   : > { %p2923_p1 = scmp.ne.s32.totalorder %s3401_s30, %s2922_s2  ;;  %p2927_p12 = scmp.lt.s32.totalorder %s3401_s30, %s3567_s6 }
 0x1ac   : > { %p2928_p5 = scmp.lt.s32.totalorder %s2926_s1, %s2922_s2 }
 0x1ad   : > { %p2924_p4 = pnand %p2923_p1, %p3180_p0 }
 0x1ae   : > { %p2929_p3 = por %p2928_p5, %p2927_p12 }
 0x1af   : > { %p2925_p8 = pneg %p2924_p4 }
 0x1b1   : > { %p2930_p10 = pnand %p2929_p3, %p2925_p8 }
 0x1b3   : > { %2933 = shalt.err (!%p2930_p10)
}
 0x1b4   : > { %s3037_s15 = smov 512   ;;  %s3038_s14 = smov 32   ;;  %v2035_v25 = vld [vmem:[%s3565_s4] sm:$0x3] }
 0x1b5   : > { %2494 = dma.vmem_to_hbm [thread:$0]  (%p3180_p0), %s3403_s9, 8192, %s3401_s30, %s2117_s28, %s3037_s15, %s3037_s15, %s3038_s14   ;;  %v3433_v15 = vrot.slane %v2035_v25, %v490_v18  ;;  %v3438_v22 = vrot.slane %v2035_v25, %v494_v21 }
 0x1b6   : > { %s2317_s16 = sshll.u32 %s3213_s12, 8  ;;  %s2476_s30 = sshll.u32 %s3018_s24, 12 }
 0x1b7   : > { %s3441_s9 = scalar_lea.vmem [#allocation10], %s2317_s16  ;;  %s3508_s17 = scalar_lea.hbm %s3566_s5, %s2476_s30 }
 0x1b8   : > { %s2131_s28 = sshll.u32 %s3441_s9, 4  ;;  %s2112_s18 = scalar_lea.sflag [#allocation4], %s3213_s12  ;;  %s3510_s28 = int_to_ptr.vmem [resolvable:$true] %s2131_s28 }
 0x1b9   : > { %s2934_s24 = scalar_lea.vmem %s3510_s28, 4096  ;;  %s3039_s1 = smov [#allocation10]  }
 0x1ba   : > { %p2935_p2 = scmp.ne.s32.totalorder %s3510_s28, %s2934_s24  ;;  %s2938_s29 = sshll.u32 %s3039_s1, 4  ;;  %s2939_s29 = int_to_ptr.vmem [resolvable:$false] %s2938_s29 }
 0x1bb   : > { %s2940_s7 = scalar_lea.vmem %s2939_s29, 8192  ;;  %p2941_p6 = scmp.lt.s32.totalorder %s3510_s28, %s2939_s29 }
 0x1bc   : > { %p2936_p11 = pnand %p2935_p2, %p3180_p0  ;;  %p2942_p9 = scmp.lt.s32.totalorder %s2940_s7, %s2934_s24 }
 0x1be   : > { %p2937_p7 = pneg %p2936_p11  ;;  %p2943_p13 = por %p2942_p9, %p2941_p6 }
 0x1c0   : > { %p2944_p1 = pnand %p2943_p13, %p2937_p7 }
 0x230   : > { %v1680_v26 = vpop.f32.mrf.mxu0  ;;  %v1793_v14 = vpop.f32.mrf.mxu1 }
 0x231   : > { %v1794_v16 = vadd.f32 %v1793_v14, %v1680_v26 }
 0x232   : > { %v1682_v19 = vpop.f32.mrf.mxu0  ;;  %v1795_v20 = vpop.f32.mrf.mxu1 }
 0x233   : > { %v1796_v27 = vadd.f32 %v1795_v20, %v1682_v19  ;;  %v2047_v30 = vadd.f32 %v3433_v15, %v1794_v16 }
 0x234   : > { %v1684_v28 = vpop.f32.mrf.mxu0  ;;  %v1797_v29 = vpop.f32.mrf.mxu1 }
 0x235   : > { %v1798_v31 = vadd.f32 %v1797_v29, %v1684_v28  ;;  %2079 = vst [vmem:[%s3441_s9] sm:$0xff] %v2047_v30  ;;  %v2048_v18 = vadd.f32 %v3438_v22, %v1796_v27 }
 0x236   : > { %v1686_v32 = vpop.f32.mrf.mxu0  ;;  %v1799_v33 = vpop.f32.mrf.mxu1 }
 0x237   : > { %v1800_v17 = vadd.f32 %v1799_v33, %v1686_v32  ;;  %2080 = vst [vmem:[%s3441_s9 + $0x8] sm:$0xff] %v2048_v18  ;;  %v2049_v35 = vadd.f32 %v3433_v15, %v1798_v31 }
 0x238   : > { %v1690_v21 = vpop.f32.mrf.mxu0  ;;  %v1803_v34 = vpop.f32.mrf.mxu1 }
 0x239   : > { %v1804_v36 = vadd.f32 %v1803_v34, %v1690_v21  ;;  %2081 = vst [vmem:[%s3441_s9 + $0x10] sm:$0xff] %v2049_v35  ;;  %v2050_v39 = vadd.f32 %v3438_v22, %v1800_v17 }
 0x23a   : > { %v1692_v37 = vpop.f32.mrf.mxu0  ;;  %v1805_v38 = vpop.f32.mrf.mxu1 }
 0x23b   : > { %v1806_v40 = vadd.f32 %v1805_v38, %v1692_v37  ;;  %2082 = vst [vmem:[%s3441_s9 + $0x18] sm:$0xff] %v2050_v39  ;;  %v2051_v43 = vadd.f32 %v3433_v15, %v1804_v36 }
 0x23c   : > { %v1694_v41 = vpop.f32.mrf.mxu0  ;;  %v1807_v42 = vpop.f32.mrf.mxu1 }
 0x23d   : > { %v1808_v44 = vadd.f32 %v1807_v42, %v1694_v41  ;;  %2083 = vst [vmem:[%s3441_s9 + $0x20] sm:$0xff] %v2051_v43  ;;  %v2052_v47 = vadd.f32 %v3438_v22, %v1806_v40 }
 0x23e   : > { %v1696_v45 = vpop.f32.mrf.mxu0  ;;  %v1809_v46 = vpop.f32.mrf.mxu1 }
 0x23f   : > { %v1810_v48 = vadd.f32 %v1809_v46, %v1696_v45  ;;  %2084 = vst [vmem:[%s3441_s9 + $0x28] sm:$0xff] %v2052_v47  ;;  %v2053_v51 = vadd.f32 %v3433_v15, %v1808_v44 }
 0x240   : > { %v1700_v49 = vpop.f32.mrf.mxu0  ;;  %v1813_v50 = vpop.f32.mrf.mxu1 }
 0x241   : > { %v1814_v52 = vadd.f32 %v1813_v50, %v1700_v49  ;;  %2085 = vst [vmem:[%s3441_s9 + $0x30] sm:$0xff] %v2053_v51  ;;  %v2054_v55 = vadd.f32 %v3438_v22, %v1810_v48 }
 0x242   : > { %v1702_v53 = vpop.f32.mrf.mxu0  ;;  %v1815_v54 = vpop.f32.mrf.mxu1 }
 0x243   : > { %v1816_v56 = vadd.f32 %v1815_v54, %v1702_v53  ;;  %2086 = vst [vmem:[%s3441_s9 + $0x38] sm:$0xff] %v2054_v55  ;;  %v2055_v59 = vadd.f32 %v3433_v15, %v1814_v52 }
 0x244   : > { %v1704_v57 = vpop.f32.mrf.mxu0  ;;  %v1817_v58 = vpop.f32.mrf.mxu1 }
 0x245   : > { %v1818_v60 = vadd.f32 %v1817_v58, %v1704_v57  ;;  %2087 = vst [vmem:[%s3441_s9 + $0x40] sm:$0xff] %v2055_v59  ;;  %v2056_v63 = vadd.f32 %v3438_v22, %v1816_v56 }
 0x246   : > { %v1706_v61 = vpop.f32.mrf.mxu0  ;;  %v1819_v62 = vpop.f32.mrf.mxu1 }
 0x247   : > { %v1820_v0 = vadd.f32 %v1819_v62, %v1706_v61  ;;  %2088 = vst [vmem:[%s3441_s9 + $0x48] sm:$0xff] %v2056_v63  ;;  %v2057_v3 = vadd.f32 %v3433_v15, %v1818_v60 }
 0x248   : > { %v1710_v1 = vpop.f32.mrf.mxu0  ;;  %v1823_v2 = vpop.f32.mrf.mxu1 }
 0x249   : > { %v1824_v4 = vadd.f32 %v1823_v2, %v1710_v1  ;;  %2089 = vst [vmem:[%s3441_s9 + $0x50] sm:$0xff] %v2057_v3  ;;  %v2058_v7 = vadd.f32 %v3438_v22, %v1820_v0 }
 0x24a   : > { %v1712_v5 = vpop.f32.mrf.mxu0  ;;  %v1825_v6 = vpop.f32.mrf.mxu1 }
 0x24b   : > { %v1826_v23 = vadd.f32 %v1825_v6, %v1712_v5  ;;  %2090 = vst [vmem:[%s3441_s9 + $0x58] sm:$0xff] %v2058_v7  ;;  %v2059_v9 = vadd.f32 %v3433_v15, %v1824_v4 }
 0x24c   : > { %v1714_v24 = vpop.f32.mrf.mxu0  ;;  %v1827_v8 = vpop.f32.mrf.mxu1 }
 0x24d   : > { %v1828_v10 = vadd.f32 %v1827_v8, %v1714_v24  ;;  %2091 = vst [vmem:[%s3441_s9 + $0x60] sm:$0xff] %v2059_v9  ;;  %v2060_v13 = vadd.f32 %v3438_v22, %v1826_v23 }
 0x24e   : > { %v1716_v11 = vpop.f32.mrf.mxu0  ;;  %v1829_v12 = vpop.f32.mrf.mxu1 }
 0x24f   : > { %v1830_v25 = vadd.f32 %v1829_v12, %v1716_v11  ;;  %2092 = vst [vmem:[%s3441_s9 + $0x68] sm:$0xff] %v2060_v13  ;;  %v2061_v16 = vadd.f32 %v3433_v15, %v1828_v10 }
 0x250   : > { %v1720_v26 = vpop.f32.mrf.mxu0  ;;  %v1833_v14 = vpop.f32.mrf.mxu1 }
 0x251   : > { %v1834_v19 = vadd.f32 %v1833_v14, %v1720_v26  ;;  %2093 = vst [vmem:[%s3441_s9 + $0x70] sm:$0xff] %v2061_v16  ;;  %v2062_v28 = vadd.f32 %v3438_v22, %v1830_v25 }
 0x252   : > { %v1722_v20 = vpop.f32.mrf.mxu0  ;;  %v1835_v27 = vpop.f32.mrf.mxu1 }
 0x253   : > { %v1836_v29 = vadd.f32 %v1835_v27, %v1722_v20  ;;  %2094 = vst [vmem:[%s3441_s9 + $0x78] sm:$0xff] %v2062_v28  ;;  %v2063_v32 = vadd.f32 %v3433_v15, %v1834_v19 }
 0x254   : > { %v1724_v30 = vpop.f32.mrf.mxu0  ;;  %v1837_v31 = vpop.f32.mrf.mxu1 }
 0x255   : > { %v1838_v33 = vadd.f32 %v1837_v31, %v1724_v30  ;;  %2095 = vst [vmem:[%s3441_s9 + $0x80] sm:$0xff] %v2063_v32  ;;  %v2064_v21 = vadd.f32 %v3438_v22, %v1836_v29 }
 0x256   : > { %v1726_v18 = vpop.f32.mrf.mxu0  ;;  %v1839_v17 = vpop.f32.mrf.mxu1 }
 0x257   : > { %v1840_v34 = vadd.f32 %v1839_v17, %v1726_v18  ;;  %2096 = vst [vmem:[%s3441_s9 + $0x88] sm:$0xff] %v2064_v21  ;;  %v2065_v37 = vadd.f32 %v3433_v15, %v1838_v33 }
 0x258   : > { %v1730_v35 = vpop.f32.mrf.mxu0  ;;  %v1843_v36 = vpop.f32.mrf.mxu1 }
 0x259   : > { %v1844_v38 = vadd.f32 %v1843_v36, %v1730_v35  ;;  %2097 = vst [vmem:[%s3441_s9 + $0x90] sm:$0xff] %v2065_v37  ;;  %v2066_v41 = vadd.f32 %v3438_v22, %v1840_v34 }
 0x25a   : > { %v1732_v39 = vpop.f32.mrf.mxu0  ;;  %v1845_v40 = vpop.f32.mrf.mxu1 }
 0x25b   : > { %v1846_v42 = vadd.f32 %v1845_v40, %v1732_v39  ;;  %2098 = vst [vmem:[%s3441_s9 + $0x98] sm:$0xff] %v2066_v41  ;;  %v2067_v45 = vadd.f32 %v3433_v15, %v1844_v38 }
 0x25c   : > { %v1734_v43 = vpop.f32.mrf.mxu0  ;;  %v1847_v44 = vpop.f32.mrf.mxu1 }
 0x25d   : > { %v1848_v46 = vadd.f32 %v1847_v44, %v1734_v43  ;;  %2099 = vst [vmem:[%s3441_s9 + $0xa0] sm:$0xff] %v2067_v45  ;;  %v2068_v49 = vadd.f32 %v3438_v22, %v1846_v42 }
 0x25e   : > { %v1736_v47 = vpop.f32.mrf.mxu0  ;;  %v1849_v48 = vpop.f32.mrf.mxu1 }
 0x25f   : > { %v1850_v50 = vadd.f32 %v1849_v48, %v1736_v47  ;;  %2100 = vst [vmem:[%s3441_s9 + $0xa8] sm:$0xff] %v2068_v49  ;;  %v2069_v53 = vadd.f32 %v3433_v15, %v1848_v46 }
 0x260   : > { %v1740_v51 = vpop.f32.mrf.mxu0  ;;  %v1853_v52 = vpop.f32.mrf.mxu1 }
 0x261   : > { %v1854_v54 = vadd.f32 %v1853_v52, %v1740_v51  ;;  %2101 = vst [vmem:[%s3441_s9 + $0xb0] sm:$0xff] %v2069_v53  ;;  %v2070_v57 = vadd.f32 %v3438_v22, %v1850_v50 }
 0x262   : > { %v1742_v55 = vpop.f32.mrf.mxu0  ;;  %v1855_v56 = vpop.f32.mrf.mxu1 }
 0x263   : > { %v1856_v58 = vadd.f32 %v1855_v56, %v1742_v55  ;;  %2102 = vst [vmem:[%s3441_s9 + $0xb8] sm:$0xff] %v2070_v57  ;;  %v2071_v61 = vadd.f32 %v3433_v15, %v1854_v54 }
 0x264   : > { %v1744_v59 = vpop.f32.mrf.mxu0  ;;  %v1857_v60 = vpop.f32.mrf.mxu1 }
 0x265   : > { %v1858_v62 = vadd.f32 %v1857_v60, %v1744_v59  ;;  %2103 = vst [vmem:[%s3441_s9 + $0xc0] sm:$0xff] %v2071_v61  ;;  %v2072_v1 = vadd.f32 %v3438_v22, %v1856_v58 }
 0x266   : > { %v1746_v63 = vpop.f32.mrf.mxu0  ;;  %v1859_v0 = vpop.f32.mrf.mxu1 }
 0x267   : > { %v1860_v2 = vadd.f32 %v1859_v0, %v1746_v63  ;;  %2104 = vst [vmem:[%s3441_s9 + $0xc8] sm:$0xff] %v2072_v1  ;;  %v2073_v5 = vadd.f32 %v3433_v15, %v1858_v62 }
 0x268   : > { %v1750_v3 = vpop.f32.mrf.mxu0  ;;  %v1863_v4 = vpop.f32.mrf.mxu1 }
 0x269   : > { %v1864_v6 = vadd.f32 %v1863_v4, %v1750_v3  ;;  %2105 = vst [vmem:[%s3441_s9 + $0xd0] sm:$0xff] %v2073_v5  ;;  %v2074_v24 = vadd.f32 %v3438_v22, %v1860_v2 }
 0x26a   : > { %v1752_v7 = vpop.f32.mrf.mxu0  ;;  %v1865_v23 = vpop.f32.mrf.mxu1 }
 0x26b   : > { %v1866_v8 = vadd.f32 %v1865_v23, %v1752_v7  ;;  %2106 = vst [vmem:[%s3441_s9 + $0xd8] sm:$0xff] %v2074_v24  ;;  %v2075_v11 = vadd.f32 %v3433_v15, %v1864_v6 }
 0x26c   : > { %v1754_v9 = vpop.f32.mrf.mxu0  ;;  %v1867_v10 = vpop.f32.mrf.mxu1 }
 0x26d   : > { %v1868_v12 = vadd.f32 %v1867_v10, %v1754_v9  ;;  %2107 = vst [vmem:[%s3441_s9 + $0xe0] sm:$0xff] %v2075_v11  ;;  %v2076_v26 = vadd.f32 %v3438_v22, %v1866_v8 }
 0x26e   : > { %v1756_v13 = vpop.f32.mrf.mxu0  ;;  %v1869_v25 = vpop.f32.mrf.mxu1 }
 0x26f   : > { %v1870_v14 = vadd.f32 %v1869_v25, %v1756_v13  ;;  %2108 = vst [vmem:[%s3441_s9 + $0xe8] sm:$0xff] %v2076_v26  ;;  %v2077_v16 = vadd.f32 %v3433_v15, %v1868_v12 }
 0x271   : > { %2109 = vst [vmem:[%s3441_s9 + $0xf0] sm:$0xff] %v2077_v16  ;;  %v2078_v19 = vadd.f32 %v3438_v22, %v1870_v14 }
 0x273   : > { %2110 = vst [vmem:[%s3441_s9 + $0xf8] sm:$0xff] %v2078_v19 }
 0x274   : > { %2947 = shalt.err (!%p2944_p1)
}
 0x275   : > { %s2948_s15 = scalar_lea.hbm %s3508_s17, 4096  ;;  %s2952_s10 = scalar_lea.hbm %s3566_s5, 8192 }
 0x276   : > { %p2949_p4 = scmp.ne.s32.totalorder %s3508_s17, %s2948_s15  ;;  %p2953_p5 = scmp.lt.s32.totalorder %s3508_s17, %s3566_s5 }
 0x277   : > { %p2954_p3 = scmp.lt.s32.totalorder %s2952_s10, %s2948_s15 }
 0x278   : > { %p2950_p8 = pnand %p2949_p4, %p3180_p0 }
 0x279   : > { %p2955_p10 = por %p2954_p3, %p2953_p5 }
 0x27a   : > { %p2951_p12 = pneg %p2950_p8 }
 0x27c   : > { %p2956_p2 = pnand %p2955_p10, %p2951_p12 }
 0x27e   : > { %2959 = shalt.err (!%p2956_p2)
}
 0x27f   : > { %s3040_s30 = smov 256   ;;  %s3041_s11 = smov 16  }
 0x280   : > { %2493 = dma.vmem_to_hbm [thread:$0]  (%p3180_p0), %s3510_s28, 4096, %s3508_s17, %s2112_s18, %s3040_s30, %s3040_s30, %s3041_s11  }
 0x281 PF: > { %s2165_s2 = sand.u32 1, %s3006_s21   ;;  %p3591_p11 = scmp.ne.s32.totalorder %s3579_s8, 0 }
 0x282   : > { %p3592_p7 = scmp.ge.s32.totalorder %s3026_s26, 2  ;;  %s2166_s24 = scalar_lea.sflag [#allocation4], %s2165_s2 }
 0x284   : > { %p2512_p6 = pnand %p3592_p7, %p3591_p11 }
 0x286   : > { %p2513_p9 = pneg %p2512_p6 }
 0x288   : > { %2997 = dma.done.wait (%p2513_p9), %s2166_s24, 4096  }
 0x289   : > { %2999 = vsyncadd (%p2513_p9), %s2166_s24, 4294963200  ;;  %s2175_s1 = scalar_lea.sflag [#allocation12], %s2165_s2 }
 0x28a   : > { %3001 = dma.done.wait (%p2513_p9), %s2175_s1, 8192  }
 0x28b   : > { %3003 = vsyncadd (%p2513_p9), %s2175_s1, 4294959104  ;;  %s28_s26 = sadd.s32 1, %s3026_s26   ;;  %s3593_s21 = smov %s3010_s22 }
 0x28c   : > { %p25_p13 = scmp.ge.s32.totalorder %s28_s26, 4   ;;  %s3594_s22 = smov %s3014_s23 }
 0x28d   : > { %s3595_s23 = smov %s3192_s13  ;;  %s3596_s24 = smov %s3022_s25 }
 0x28e   : > { %s3597_s25 = smov %s3599_s20  ;;  %27 = sbr.rel (!%p25_p13) target bundleno = 13 (0xd), region = 125 }
 0x293   :  { %2180 = vsyncpa [#allocation3], 1 }
 0x294   :  { %2182 = vsyncpa [#allocation3 + $0x1], 1 }
 0x295   :  { %2183 = vsyncpa [#allocation6], 1 }
 0x296   :  { %2184 = vsyncpa [#allocation9], 1 }
 0x297   :  { %2185 = vsyncpa [#allocation4], 1 }
 0x298   :  { %2187 = vsyncpa [#allocation4 + $0x1], 1 }
 0x299   :  { %2188 = vsyncpa [#allocation12], 1 }
 0x29a   :  { %2190 = vsyncpa [#allocation12 + $0x1], 1 }

</bundles_post_ra>
